<compile_context>
chip_gen: v5e
topology: v5e:2x2
jax: 0.10.0
libtpu: 0.0.40
codegen_flags: <defaults>
</compile_context>

<pallas_src>
import functools

import jax
import jax.numpy as jnp
from jax.experimental import pallas as pl
from jax.experimental.pallas import tpu as pltpu


# --------------------------------------------------------------------------
# Pallas kernels
# --------------------------------------------------------------------------
def skip_conv_relu_kernel(patches_ref, w_ref, o_ref):
    """Fused skip_part + ReLU: relu(im2col(x) @ W_fused).  bf16 in, f32 acc."""
    acc = jnp.dot(patches_ref[...], w_ref[...],
                  preferred_element_type=jnp.float32)
    o_ref[...] = jnp.maximum(acc, 0.0).astype(o_ref.dtype)


def final_pool_adaptor_kernel(patches_ref, w_ref, pool_ref, adaptor_ref,
                              o_ref, acc_ref, *, inv_spatial):
    """Last layer: relu(conv+skip), global average pool (as a matmul with a
    0/1 batch-membership matrix), then the folded linear_adaptor matmul.

    Accumulates the pooled embedding across row tiles in a VMEM scratch and
    only applies the (cheap) adaptor matmul once, at the final grid step.
    """
    @pl.when(pl.program_id(0) == 0)
    def _():
        acc_ref[...] = jnp.zeros_like(acc_ref)

    conv = jnp.dot(patches_ref[...], w_ref[...],
                   preferred_element_type=jnp.float32)
    act = jnp.maximum(conv, 0.0).astype(jnp.bfloat16)
    acc_ref[...] += jnp.dot(pool_ref[...], act,
                            preferred_element_type=jnp.float32)

    @pl.when(pl.program_id(0) == pl.num_programs(0) - 1)
    def _():
        emb = (acc_ref[...] * inv_spatial).astype(jnp.bfloat16)
        o_ref[...] = jnp.dot(emb, adaptor_ref[...],
                             preferred_element_type=jnp.float32
                             ).astype(o_ref.dtype)


# --------------------------------------------------------------------------
# Glue: im2col + weight folding + pallas_call wrappers
# --------------------------------------------------------------------------
def _round_up(x, m):
    return ((x + m - 1) // m) * m


def _im2col(x_nhwc, ksize, stride, pad):
    """3x3 patch extraction (kh-major, kw-minor, channel-last column order)."""
    n, h, w, c = x_nhwc.shape
    xp = jnp.pad(x_nhwc, ((0, 0), (pad, pad), (pad, pad), (0, 0)))
    ho = (h + 2 * pad - ksize) // stride + 1
    wo = (w + 2 * pad - ksize) // stride + 1
    cols = []
    for kh in range(ksize):
        for kw in range(ksize):
            cols.append(xp[:, kh:kh + stride * ho:stride,
                           kw:kw + stride * wo:stride, :])
    patches = jnp.stack(cols, axis=-2)                     # (N,Ho,Wo,9,C)
    patches = patches.reshape(n * ho * wo, ksize * ksize * c)
    return patches, (n, ho, wo)


def _prep_weight(w_oihw, skip_oi11):
    """OIHW -> flattened (k, cout_pad) bf16 weight, skip folded into centre tap."""
    cout, cin, kh, kw = w_oihw.shape
    k = kh * kw * cin
    w_flat = jnp.transpose(w_oihw, (2, 3, 1, 0)).reshape(k, cout)
    if skip_oi11 is not None:
        skip_mat = jnp.transpose(skip_oi11[:, :, 0, 0], (1, 0))   # (cin, cout)
        off = ((kh // 2) * kw + (kw // 2)) * cin                  # centre tap rows
        w_flat = w_flat.at[off:off + cin, :].add(skip_mat)
    cout_pad = _round_up(cout, 128)
    w_pad = jnp.zeros((k, cout_pad), jnp.float32).at[:, :cout].set(w_flat)
    return w_pad.astype(jnp.bfloat16), k, cout, cout_pad


def _tile_rows(patches):
    """Pad rows to a multiple of the tile (<=512, multiple of 16 for bf16)."""
    m = patches.shape[0]
    tm = min(512, _round_up(m, 16))
    grid_m = pl.cdiv(m, tm)
    m_pad = grid_m * tm
    if m_pad != m:
        patches = jnp.pad(patches, ((0, m_pad - m), (0, 0)))
    return patches.astype(jnp.bfloat16), m, m_pad, tm, grid_m


def fused_skip_conv(x_nhwc, w_oihw, skip_oi11, stride):
    """skip_part.forward (+ReLU).  Returns bf16 NHWC activations."""
    _, _, kh, _ = w_oihw.shape
    patches, (n, ho, wo) = _im2col(x_nhwc, kh, stride, pad=1)
    w_pad, k, cout, cout_pad = _prep_weight(w_oihw, skip_oi11)
    patches, m, m_pad, tm, grid_m = _tile_rows(patches)

    out = pl.pallas_call(
        skip_conv_relu_kernel,
        out_shape=jax.ShapeDtypeStruct((m_pad, cout_pad), jnp.bfloat16),
        grid=(grid_m,),
        in_specs=[
            pl.BlockSpec((tm, k), lambda i: (i, 0)),
            pl.BlockSpec((k, cout_pad), lambda i: (0, 0)),
        ],
        out_specs=pl.BlockSpec((tm, cout_pad), lambda i: (i, 0)),
        compiler_params=pltpu.CompilerParams(
            dimension_semantics=("parallel",)),
    )(patches, w_pad)

    return out[:m, :cout].reshape(n, ho, wo, cout)


def fused_final_layer(x_nhwc, w_oihw, skip_oi11, stride, adaptor_oi11):
    """Last skip_part + ReLU + global avg pool + linear_adaptor, one kernel."""
    _, _, kh, _ = w_oihw.shape
    patches, (n, ho, wo) = _im2col(x_nhwc, kh, stride, pad=1)
    w_pad, k, cout, cout_pad = _prep_weight(w_oihw, skip_oi11)
    patches, m, m_pad, tm, grid_m = _tile_rows(patches)

    # adaptor weight (feat, feat, 1, 1) -> (cout_pad, feat_pad) bf16
    feat = adaptor_oi11.shape[0]
    feat_pad = _round_up(feat, 128)
    a_t = jnp.transpose(adaptor_oi11[:, :, 0, 0], (1, 0))        # (cout, feat)
    a_pad = jnp.zeros((cout_pad, feat_pad), jnp.float32
                      ).at[:cout, :feat].set(a_t).astype(jnp.bfloat16)

    # 0/1 batch-membership pooling matrix (n_pad, m_pad); scaling done in f32
    # inside the kernel finalize step.
    n_pad = _round_up(n, 8)
    rows = jnp.arange(m_pad)
    batch_of_row = rows // (ho * wo)
    pool = ((batch_of_row[None, :] == jnp.arange(n_pad)[:, None])
            & (rows[None, :] < m)).astype(jnp.bfloat16)

    kernel = functools.partial(final_pool_adaptor_kernel,
                               inv_spatial=1.0 / float(ho * wo))

    out = pl.pallas_call(
        kernel,
        out_shape=jax.ShapeDtypeStruct((n_pad, feat_pad), jnp.float32),
        grid=(grid_m,),
        in_specs=[
            pl.BlockSpec((tm, k), lambda i: (i, 0)),
            pl.BlockSpec((k, cout_pad), lambda i: (0, 0)),
            pl.BlockSpec((n_pad, tm), lambda i: (0, i)),
            pl.BlockSpec((cout_pad, feat_pad), lambda i: (0, 0)),
        ],
        out_specs=pl.BlockSpec((n_pad, feat_pad), lambda i: (0, 0)),
        scratch_shapes=[pltpu.VMEM((n_pad, cout_pad), jnp.float32)],
        compiler_params=pltpu.CompilerParams(
            dimension_semantics=("arbitrary",)),   # output resident -> reduction
    )(patches, w_pad, pool, a_pad)

    return out[:n, :feat]


# --------------------------------------------------------------------------
# Synthetic backbone (stand-in for `original_model`) + skip_adaptor forward
# --------------------------------------------------------------------------
def make_params():
    key = jax.random.PRNGKey(0)
    ks = jax.random.split(key, 6)
    p = {
        # stem conv (not a layerN child -> no skip branch)
        "w_stem": jax.random.normal(ks[0], (8, 3, 3, 3), jnp.float32) * 0.1,
        # layer1..layer4 3x3 convs wrapped as skip_part (skip init = ones)
        "w1": jax.random.normal(ks[1], (8, 8, 3, 3), jnp.float32) * 0.1,
        "w2": jax.random.normal(ks[2], (16, 8, 3, 3), jnp.float32) * 0.1,
        "w3": jax.random.normal(ks[3], (32, 16, 3, 3), jnp.float32) * 0.1,
        "w4": jax.random.normal(ks[4], (32, 32, 3, 3), jnp.float32) * 0.1,
        "skip1": jnp.ones((8, 8, 1, 1), jnp.float32),
        "skip2": jnp.ones((16, 8, 1, 1), jnp.float32),
        "skip3": jnp.ones((32, 16, 1, 1), jnp.float32),
        "skip4": jnp.ones((32, 32, 1, 1), jnp.float32),
        # linear_adaptor weight: torch.ones(feat_dim, feat_dim, 1, 1)
        "w_bias": jnp.ones((32, 32, 1, 1), jnp.float32),
    }
    return p, ks[5]


@jax.jit
def skip_adaptor_forward(params, x_nchw):
    """backbone.embed(x) with skip_part convs, then linear_adaptor (fused)."""
    x = jnp.transpose(x_nchw, (0, 2, 3, 1))                    # NCHW -> NHWC
    y = fused_skip_conv(x, params["w_stem"], None, stride=1)   # stem: no skip
    y = fused_skip_conv(y, params["w1"], params["skip1"], stride=1)
    y = fused_skip_conv(y, params["w2"], params["skip2"], stride=2)
    y = fused_skip_conv(y, params["w3"], params["skip3"], stride=2)
    # last layer: ReLU + global average pool + linear_adaptor fused in-kernel
    return fused_final_layer(y, params["w4"], params["skip4"], stride=1,
                             adaptor_oi11=params["w_bias"])     # (N, 32)


# --------------------------------------------------------------------------
# Pure-JAX reference (lax conv, NCHW).  Conv operands are rounded to bf16 to
# mirror the MXU-native operand dtype used by the Pallas path (f32 accumulate),
# so the comparison validates kernel structure rather than bf16 rounding.
# --------------------------------------------------------------------------
def _conv_ref(x, w, stride, pad):
    return jax.lax.conv_general_dilated(
        x.astype(jnp.bfloat16), w.astype(jnp.bfloat16),
        (stride, stride), ((pad, pad), (pad, pad)),
        dimension_numbers=("NCHW", "OIHW", "NCHW"),
        preferred_element_type=jnp.float32)


@jax.jit
def skip_adaptor_reference(params, x_nchw):
    def skip_part(x, w, skip, s):
        return _conv_ref(x, w, s, 1) + _conv_ref(x, skip, s, 0)

    y = jax.nn.relu(_conv_ref(x_nchw, params["w_stem"], 1, 1))
    y = jax.nn.relu(skip_part(y, params["w1"], params["skip1"], 1))
    y = jax.nn.relu(skip_part(y, params["w2"], params["skip2"], 2))
    y = jax.nn.relu(skip_part(y, params["w3"], params["skip3"], 2))
    y = jax.nn.relu(skip_part(y, params["w4"], params["skip4"], 1))
    emb = jnp.mean(y, axis=(2, 3))                             # (N, 32)
    wt = jnp.transpose(params["w_bias"][:, :, 0, 0], (1, 0))
    return jnp.dot(emb.astype(jnp.bfloat16), wt.astype(jnp.bfloat16),
                   preferred_element_type=jnp.float32)


# --------------------------------------------------------------------------
if __name__ == "__main__":
    params, xkey = make_params()
    x = jax.random.normal(xkey, (2, 3, 16, 16), jnp.float32)   # NCHW, like PyTorch

    out = jax.block_until_ready(skip_adaptor_forward(params, x))
    ref = jax.block_until_ready(skip_adaptor_reference(params, x))

    assert out.shape == (2, 32), out.shape
    assert jnp.allclose(out, ref, rtol=3e-2, atol=3e-2), float(
        jnp.max(jnp.abs(out - ref)))
    print("KERNEL_OK")
</pallas_src>

<mosaic_0001>
module attributes {stable_mosaic.version = 11 : i64} {
  func.func @skip_conv_relu_kernel(%arg0: i32, %arg1: memref<512x27xbf16, #tpu.memory_space<vmem>>, %arg2: memref<27x128xbf16, #tpu.memory_space<vmem>>, %arg3: memref<512x128xbf16, #tpu.memory_space<vmem>>) attributes {dimension_semantics = [#tpu.dimension_semantics<parallel>], iteration_bounds = array<i64: 1>, scalar_prefetch = 0 : i64, scratch_operands = 0 : i64, tpu.core_type = #tpu.core_type<tc>, window_params = [{transform_indices = @transform_0, window_bounds = array<i64: 512, 27>}, {pipeline_mode = #tpu.pipeline_mode<synchronous>, transform_indices = @transform_1, window_bounds = array<i64: 27, 128>}, {transform_indices = @transform_2, window_bounds = array<i64: 512, 128>}]} {
    %c0 = arith.constant 0 : index
    %c0_0 = arith.constant 0 : index
    %0 = vector.load %arg1[%c0, %c0_0] : memref<512x27xbf16, #tpu.memory_space<vmem>>, vector<512x27xbf16>
    %c0_1 = arith.constant 0 : index
    %c0_2 = arith.constant 0 : index
    %1 = vector.load %arg2[%c0_1, %c0_2] : memref<27x128xbf16, #tpu.memory_space<vmem>>, vector<27x128xbf16>
    %cst = arith.constant dense<0.000000e+00> : vector<512x128xf32>
    %2 = tpu.matmul %0, %1, %cst {dimension_numbers = #tpu.dot_dimension_numbers<[1], [0], [0], [1], [0, 0, 1, 1], [], []>} : vector<512x27xbf16>, vector<27x128xbf16>, vector<512x128xf32> -> vector<512x128xf32>
    %cst_3 = arith.constant 0.000000e+00 : f32
    %3 = vector.broadcast %cst_3 : f32 to vector<512x128xf32>
    %4 = arith.maximumf %2, %3 : vector<512x128xf32>
    %5 = arith.truncf %4 : vector<512x128xf32> to vector<512x128xbf16>
    %c0_4 = arith.constant 0 : index
    %c0_5 = arith.constant 0 : index
    %6 = vector.load %arg3[%c0_4, %c0_5] : memref<512x128xbf16, #tpu.memory_space<vmem>>, vector<512x128xbf16>
    tpu.vector_store %arg3[%c0_4, %c0_5], %5 {strides = array<i32>} : memref<512x128xbf16, #tpu.memory_space<vmem>>, vector<512x128xbf16>,
    return
  }
  func.func @transform_0(%arg0: i32) -> (i32, i32) {
    %c0_i32 = arith.constant 0 : i32
    %c0_i32_0 = arith.constant 0 : i32
    return %arg0, %c0_i32 : i32, i32
  }
  func.func @transform_1(%arg0: i32) -> (i32, i32) {
    %c0_i32 = arith.constant 0 : i32
    %c0_i32_0 = arith.constant 0 : i32
    %c0_i32_1 = arith.constant 0 : i32
    return %c0_i32, %c0_i32_0 : i32, i32
  }
  func.func @transform_2(%arg0: i32) -> (i32, i32) {
    %c0_i32 = arith.constant 0 : i32
    %c0_i32_0 = arith.constant 0 : i32
    return %arg0, %c0_i32 : i32, i32
  }
}

module attributes {stable_mosaic.version = 11 : i64} {
  func.func @skip_conv_relu_kernel(%arg0: i32, %arg1: memref<512x72xbf16, #tpu.memory_space<vmem>>, %arg2: memref<72x128xbf16, #tpu.memory_space<vmem>>, %arg3: memref<512x128xbf16, #tpu.memory_space<vmem>>) attributes {dimension_semantics = [#tpu.dimension_semantics<parallel>], iteration_bounds = array<i64: 1>, scalar_prefetch = 0 : i64, scratch_operands = 0 : i64, tpu.core_type = #tpu.core_type<tc>, window_params = [{transform_indices = @transform_0, window_bounds = array<i64: 512, 72>}, {pipeline_mode = #tpu.pipeline_mode<synchronous>, transform_indices = @transform_1, window_bounds = array<i64: 72, 128>}, {transform_indices = @transform_2, window_bounds = array<i64: 512, 128>}]} {
    %c0 = arith.constant 0 : index
    %c0_0 = arith.constant 0 : index
    %0 = vector.load %arg1[%c0, %c0_0] : memref<512x72xbf16, #tpu.memory_space<vmem>>, vector<512x72xbf16>
    %c0_1 = arith.constant 0 : index
    %c0_2 = arith.constant 0 : index
    %1 = vector.load %arg2[%c0_1, %c0_2] : memref<72x128xbf16, #tpu.memory_space<vmem>>, vector<72x128xbf16>
    %cst = arith.constant dense<0.000000e+00> : vector<512x128xf32>
    %2 = tpu.matmul %0, %1, %cst {dimension_numbers = #tpu.dot_dimension_numbers<[1], [0], [0], [1], [0, 0, 1, 1], [], []>} : vector<512x72xbf16>, vector<72x128xbf16>, vector<512x128xf32> -> vector<512x128xf32>
    %cst_3 = arith.constant 0.000000e+00 : f32
    %3 = vector.broadcast %cst_3 : f32 to vector<512x128xf32>
    %4 = arith.maximumf %2, %3 : vector<512x128xf32>
    %5 = arith.truncf %4 : vector<512x128xf32> to vector<512x128xbf16>
    %c0_4 = arith.constant 0 : index
    %c0_5 = arith.constant 0 : index
    %6 = vector.load %arg3[%c0_4, %c0_5] : memref<512x128xbf16, #tpu.memory_space<vmem>>, vector<512x128xbf16>
    tpu.vector_store %arg3[%c0_4, %c0_5], %5 {strides = array<i32>} : memref<512x128xbf16, #tpu.memory_space<vmem>>, vector<512x128xbf16>,
    return
  }
  func.func @transform_0(%arg0: i32) -> (i32, i32) {
    %c0_i32 = arith.constant 0 : i32
    %c0_i32_0 = arith.constant 0 : i32
    return %arg0, %c0_i32 : i32, i32
  }
  func.func @transform_1(%arg0: i32) -> (i32, i32) {
    %c0_i32 = arith.constant 0 : i32
    %c0_i32_0 = arith.constant 0 : i32
    %c0_i32_1 = arith.constant 0 : i32
    return %c0_i32, %c0_i32_0 : i32, i32
  }
  func.func @transform_2(%arg0: i32) -> (i32, i32) {
    %c0_i32 = arith.constant 0 : i32
    %c0_i32_0 = arith.constant 0 : i32
    return %arg0, %c0_i32 : i32, i32
  }
}

module attributes {stable_mosaic.version = 11 : i64} {
  func.func @skip_conv_relu_kernel(%arg0: i32, %arg1: memref<128x72xbf16, #tpu.memory_space<vmem>>, %arg2: memref<72x128xbf16, #tpu.memory_space<vmem>>, %arg3: memref<128x128xbf16, #tpu.memory_space<vmem>>) attributes {dimension_semantics = [#tpu.dimension_semantics<parallel>], iteration_bounds = array<i64: 1>, scalar_prefetch = 0 : i64, scratch_operands = 0 : i64, tpu.core_type = #tpu.core_type<tc>, window_params = [{transform_indices = @transform_0, window_bounds = array<i64: 128, 72>}, {pipeline_mode = #tpu.pipeline_mode<synchronous>, transform_indices = @transform_1, window_bounds = array<i64: 72, 128>}, {transform_indices = @transform_2, window_bounds = array<i64: 128, 128>}]} {
    %c0 = arith.constant 0 : index
    %c0_0 = arith.constant 0 : index
    %0 = vector.load %arg1[%c0, %c0_0] : memref<128x72xbf16, #tpu.memory_space<vmem>>, vector<128x72xbf16>
    %c0_1 = arith.constant 0 : index
    %c0_2 = arith.constant 0 : index
    %1 = vector.load %arg2[%c0_1, %c0_2] : memref<72x128xbf16, #tpu.memory_space<vmem>>, vector<72x128xbf16>
    %cst = arith.constant dense<0.000000e+00> : vector<128x128xf32>
    %2 = tpu.matmul %0, %1, %cst {dimension_numbers = #tpu.dot_dimension_numbers<[1], [0], [0], [1], [0, 0, 1, 1], [], []>} : vector<128x72xbf16>, vector<72x128xbf16>, vector<128x128xf32> -> vector<128x128xf32>
    %cst_3 = arith.constant 0.000000e+00 : f32
    %3 = vector.broadcast %cst_3 : f32 to vector<128x128xf32>
    %4 = arith.maximumf %2, %3 : vector<128x128xf32>
    %5 = arith.truncf %4 : vector<128x128xf32> to vector<128x128xbf16>
    %c0_4 = arith.constant 0 : index
    %c0_5 = arith.constant 0 : index
    %6 = vector.load %arg3[%c0_4, %c0_5] : memref<128x128xbf16, #tpu.memory_space<vmem>>, vector<128x128xbf16>
    tpu.vector_store %arg3[%c0_4, %c0_5], %5 {strides = array<i32>} : memref<128x128xbf16, #tpu.memory_space<vmem>>, vector<128x128xbf16>,
    return
  }
  func.func @transform_0(%arg0: i32) -> (i32, i32) {
    %c0_i32 = arith.constant 0 : i32
    %c0_i32_0 = arith.constant 0 : i32
    return %arg0, %c0_i32 : i32, i32
  }
  func.func @transform_1(%arg0: i32) -> (i32, i32) {
    %c0_i32 = arith.constant 0 : i32
    %c0_i32_0 = arith.constant 0 : i32
    %c0_i32_1 = arith.constant 0 : i32
    return %c0_i32, %c0_i32_0 : i32, i32
  }
  func.func @transform_2(%arg0: i32) -> (i32, i32) {
    %c0_i32 = arith.constant 0 : i32
    %c0_i32_0 = arith.constant 0 : i32
    return %arg0, %c0_i32 : i32, i32
  }
}

module attributes {stable_mosaic.version = 11 : i64} {
  func.func @skip_conv_relu_kernel(%arg0: i32, %arg1: memref<32x144xbf16, #tpu.memory_space<vmem>>, %arg2: memref<144x128xbf16, #tpu.memory_space<vmem>>, %arg3: memref<32x128xbf16, #tpu.memory_space<vmem>>) attributes {dimension_semantics = [#tpu.dimension_semantics<parallel>], iteration_bounds = array<i64: 1>, scalar_prefetch = 0 : i64, scratch_operands = 0 : i64, tpu.core_type = #tpu.core_type<tc>, window_params = [{transform_indices = @transform_0, window_bounds = array<i64: 32, 144>}, {pipeline_mode = #tpu.pipeline_mode<synchronous>, transform_indices = @transform_1, window_bounds = array<i64: 144, 128>}, {transform_indices = @transform_2, window_bounds = array<i64: 32, 128>}]} {
    %c0 = arith.constant 0 : index
    %c0_0 = arith.constant 0 : index
    %0 = vector.load %arg1[%c0, %c0_0] : memref<32x144xbf16, #tpu.memory_space<vmem>>, vector<32x144xbf16>
    %c0_1 = arith.constant 0 : index
    %c0_2 = arith.constant 0 : index
    %1 = vector.load %arg2[%c0_1, %c0_2] : memref<144x128xbf16, #tpu.memory_space<vmem>>, vector<144x128xbf16>
    %cst = arith.constant dense<0.000000e+00> : vector<32x128xf32>
    %2 = tpu.matmul %0, %1, %cst {dimension_numbers = #tpu.dot_dimension_numbers<[1], [0], [0], [1], [0, 0, 1, 1], [], []>} : vector<32x144xbf16>, vector<144x128xbf16>, vector<32x128xf32> -> vector<32x128xf32>
    %cst_3 = arith.constant 0.000000e+00 : f32
    %3 = vector.broadcast %cst_3 : f32 to vector<32x128xf32>
    %4 = arith.maximumf %2, %3 : vector<32x128xf32>
    %5 = arith.truncf %4 : vector<32x128xf32> to vector<32x128xbf16>
    %c0_4 = arith.constant 0 : index
    %c0_5 = arith.constant 0 : index
    %6 = vector.load %arg3[%c0_4, %c0_5] : memref<32x128xbf16, #tpu.memory_space<vmem>>, vector<32x128xbf16>
    tpu.vector_store %arg3[%c0_4, %c0_5], %5 {strides = array<i32>} : memref<32x128xbf16, #tpu.memory_space<vmem>>, vector<32x128xbf16>,
    return
  }
  func.func @transform_0(%arg0: i32) -> (i32, i32) {
    %c0_i32 = arith.constant 0 : i32
    %c0_i32_0 = arith.constant 0 : i32
    return %arg0, %c0_i32 : i32, i32
  }
  func.func @transform_1(%arg0: i32) -> (i32, i32) {
    %c0_i32 = arith.constant 0 : i32
    %c0_i32_0 = arith.constant 0 : i32
    %c0_i32_1 = arith.constant 0 : i32
    return %c0_i32, %c0_i32_0 : i32, i32
  }
  func.func @transform_2(%arg0: i32) -> (i32, i32) {
    %c0_i32 = arith.constant 0 : i32
    %c0_i32_0 = arith.constant 0 : i32
    return %arg0, %c0_i32 : i32, i32
  }
}

module attributes {stable_mosaic.version = 11 : i64} {
  func.func @final_pool_adaptor_kernel(%arg0: i32, %arg1: memref<32x288xbf16, #tpu.memory_space<vmem>>, %arg2: memref<288x128xbf16, #tpu.memory_space<vmem>>, %arg3: memref<8x32xbf16, #tpu.memory_space<vmem>>, %arg4: memref<128x128xbf16, #tpu.memory_space<vmem>>, %arg5: memref<8x128xf32, #tpu.memory_space<vmem>>, %arg6: memref<8x128xf32, #tpu.memory_space<vmem>>) attributes {dimension_semantics = [#tpu.dimension_semantics<arbitrary>], iteration_bounds = array<i64: 1>, scalar_prefetch = 0 : i64, scratch_operands = 1 : i64, tpu.core_type = #tpu.core_type<tc>, window_params = [{transform_indices = @transform_0, window_bounds = array<i64: 32, 288>}, {pipeline_mode = #tpu.pipeline_mode<synchronous>, transform_indices = @transform_1, window_bounds = array<i64: 288, 128>}, {transform_indices = @transform_2, window_bounds = array<i64: 8, 32>}, {pipeline_mode = #tpu.pipeline_mode<synchronous>, transform_indices = @transform_3, window_bounds = array<i64: 128, 128>}, {pipeline_mode = #tpu.pipeline_mode<synchronous>, transform_indices = @transform_4, window_bounds = array<i64: 8, 128>}]} {
    %c0_i32 = arith.constant 0 : i32
    %0 = arith.cmpi eq, %arg0, %c0_i32 : i32
    %1 = arith.extui %0 : i1 to i32
    %c0_i32_0 = arith.constant 0 : i32
    %2 = arith.cmpi ne, %1, %c0_i32_0 : i32
    scf.if %2 {
      %cst_14 = arith.constant 0.000000e+00 : f32
      %17 = vector.broadcast %cst_14 : f32 to vector<8x128xf32>
      %c0_15 = arith.constant 0 : index
      %c0_16 = arith.constant 0 : index
      %18 = vector.load %arg6[%c0_15, %c0_16] : memref<8x128xf32, #tpu.memory_space<vmem>>, vector<8x128xf32>
      tpu.vector_store %arg6[%c0_15, %c0_16], %17 {strides = array<i32>} : memref<8x128xf32, #tpu.memory_space<vmem>>, vector<8x128xf32>,
    } else {
    }
    %c0 = arith.constant 0 : index
    %c0_1 = arith.constant 0 : index
    %3 = vector.load %arg1[%c0, %c0_1] : memref<32x288xbf16, #tpu.memory_space<vmem>>, vector<32x288xbf16>
    %c0_2 = arith.constant 0 : index
    %c0_3 = arith.constant 0 : index
    %4 = vector.load %arg2[%c0_2, %c0_3] : memref<288x128xbf16, #tpu.memory_space<vmem>>, vector<288x128xbf16>
    %cst = arith.constant dense<0.000000e+00> : vector<32x128xf32>
    %5 = tpu.matmul %3, %4, %cst {dimension_numbers = #tpu.dot_dimension_numbers<[1], [0], [0], [1], [0, 0, 1, 1], [], []>} : vector<32x288xbf16>, vector<288x128xbf16>, vector<32x128xf32> -> vector<32x128xf32>
    %cst_4 = arith.constant 0.000000e+00 : f32
    %6 = vector.broadcast %cst_4 : f32 to vector<32x128xf32>
    %7 = arith.maximumf %5, %6 : vector<32x128xf32>
    %8 = arith.truncf %7 : vector<32x128xf32> to vector<32x128xbf16>
    %c0_5 = arith.constant 0 : index
    %c0_6 = arith.constant 0 : index
    %9 = vector.load %arg6[%c0_5, %c0_6] : memref<8x128xf32, #tpu.memory_space<vmem>>, vector<8x128xf32>
    %c0_7 = arith.constant 0 : index
    %c0_8 = arith.constant 0 : index
    %10 = vector.load %arg3[%c0_7, %c0_8] : memref<8x32xbf16, #tpu.memory_space<vmem>>, vector<8x32xbf16>
    %cst_9 = arith.constant dense<0.000000e+00> : vector<8x128xf32>
    %11 = tpu.matmul %10, %8, %cst_9 {dimension_numbers = #tpu.dot_dimension_numbers<[1], [0], [0], [1], [0, 0, 1, 1], [], []>} : vector<8x32xbf16>, vector<32x128xbf16>, vector<8x128xf32> -> vector<8x128xf32>
    %12 = arith.addf %9, %11 : vector<8x128xf32>
    %c0_10 = arith.constant 0 : index
    %c0_11 = arith.constant 0 : index
    %13 = vector.load %arg6[%c0_10, %c0_11] : memref<8x128xf32, #tpu.memory_space<vmem>>, vector<8x128xf32>
    tpu.vector_store %arg6[%c0_10, %c0_11], %12 {strides = array<i32>} : memref<8x128xf32, #tpu.memory_space<vmem>>, vector<8x128xf32>,
    %c0_i32_12 = arith.constant 0 : i32
    %14 = arith.cmpi eq, %arg0, %c0_i32_12 : i32
    %15 = arith.extui %14 : i1 to i32
    %c0_i32_13 = arith.constant 0 : i32
    %16 = arith.cmpi ne, %15, %c0_i32_13 : i32
    scf.if %16 {
      %c0_14 = arith.constant 0 : index
      %c0_15 = arith.constant 0 : index
      %17 = vector.load %arg6[%c0_14, %c0_15] : memref<8x128xf32, #tpu.memory_space<vmem>>, vector<8x128xf32>
      %cst_16 = arith.constant 6.250000e-02 : f32
      %18 = vector.broadcast %cst_16 : f32 to vector<8x128xf32>
      %19 = arith.mulf %17, %18 : vector<8x128xf32>
      %20 = arith.truncf %19 : vector<8x128xf32> to vector<8x128xbf16>
      %c0_17 = arith.constant 0 : index
      %c0_18 = arith.constant 0 : index
      %21 = vector.load %arg4[%c0_17, %c0_18] : memref<128x128xbf16, #tpu.memory_space<vmem>>, vector<128x128xbf16>
      %cst_19 = arith.constant dense<0.000000e+00> : vector<8x128xf32>
      %22 = tpu.matmul %20, %21, %cst_19 {dimension_numbers = #tpu.dot_dimension_numbers<[1], [0], [0], [1], [0, 0, 1, 1], [], []>} : vector<8x128xbf16>, vector<128x128xbf16>, vector<8x128xf32> -> vector<8x128xf32>
      %c0_20 = arith.constant 0 : index
      %c0_21 = arith.constant 0 : index
      %23 = vector.load %arg5[%c0_20, %c0_21] : memref<8x128xf32, #tpu.memory_space<vmem>>, vector<8x128xf32>
      tpu.vector_store %arg5[%c0_20, %c0_21], %22 {strides = array<i32>} : memref<8x128xf32, #tpu.memory_space<vmem>>, vector<8x128xf32>,
    } else {
    }
    return
  }
  func.func @transform_0(%arg0: i32) -> (i32, i32) {
    %c0_i32 = arith.constant 0 : i32
    %c0_i32_0 = arith.constant 0 : i32
    return %arg0, %c0_i32 : i32, i32
  }
  func.func @transform_1(%arg0: i32) -> (i32, i32) {
    %c0_i32 = arith.constant 0 : i32
    %c0_i32_0 = arith.constant 0 : i32
    %c0_i32_1 = arith.constant 0 : i32
    return %c0_i32, %c0_i32_0 : i32, i32
  }
  func.func @transform_2(%arg0: i32) -> (i32, i32) {
    %c0_i32 = arith.constant 0 : i32
    %c0_i32_0 = arith.constant 0 : i32
    return %c0_i32, %arg0 : i32, i32
  }
  func.func @transform_3(%arg0: i32) -> (i32, i32) {
    %c0_i32 = arith.constant 0 : i32
    %c0_i32_0 = arith.constant 0 : i32
    %c0_i32_1 = arith.constant 0 : i32
    return %c0_i32, %c0_i32_0 : i32, i32
  }
  func.func @transform_4(%arg0: i32) -> (i32, i32) {
    %c0_i32 = arith.constant 0 : i32
    %c0_i32_0 = arith.constant 0 : i32
    %c0_i32_1 = arith.constant 0 : i32
    return %c0_i32, %c0_i32_0 : i32, i32
  }
}

</mosaic_0001>

<bundles_post_ra>
// kernel: skip_adaptor_forward.5
= control target key start
LH: loop header
LB: loop body
LE: loop exit
PB: predicated region body
PF: predicated region fallthrough
CT: control target
= control target key end

     0   :  { %vm348_vm0 = vcmask 1044480   ;;  %vm349_vm1 = vcmask 1045504   ;;  %v1120_v2 = vmov 65535   ;;  %vm251_vm2 = vcmask 220160   ;;  %s1369_s1 = inlined_call_operand.vmem [shape: bf16[27,128], index: 1, kind: input, shape index: {}]   ;;  %s1370_s0 = inlined_call_operand.vmem [shape: bf16[512,27], index: 0, kind: input, shape index: {}]   ;;  %s1371_s2 = inlined_call_operand.vmem [shape: bf16[512,128], index: 2, kind: output, shape index: {}]  }
   0x1   :  { %v854_v0 = vld [vmem:[%s1369_s1 + $0x8] sm:$0xf]  ;;  %v921_v1 = vld [vmem:[%s1369_s1 + $0x8] sm:$0x30]  ;;  %v350_v3 = vsel %vm348_vm0, 4294967295, %v1120_v2  ;;  %v920_v7 = vld [vmem:[%s1369_s1] sm:$0xff] }
   0x2   :  { %v855_v4 = vor.u32 %v921_v1, %v854_v0  ;;  %v351_v5 = vsel %vm349_vm1, %v350_v3, 0  ;;  %v888_v8 = vld [vmem:[%s1370_s0] sm:$0xff]  ;;  %v889_v12 = vld [vmem:[%s1370_s0 + $0x8] sm:$0xff]  ;;  %v890_v16 = vld [vmem:[%s1370_s0 + $0x10] sm:$0xff] }
   0x3   :  { %v896_v9 = vld [vmem:[%s1370_s0 + $0x40] sm:$0xff]  ;;  %v897_v13 = vld [vmem:[%s1370_s0 + $0x48] sm:$0xff]  ;;  %v898_v17 = vld [vmem:[%s1370_s0 + $0x50] sm:$0xff] }
   0x4   :  { %v353_v6 = vand.u32 %v855_v4, %v351_v5  ;;  %v904_v10 = vld [vmem:[%s1370_s0 + $0x80] sm:$0xff]  ;;  %v905_v14 = vld [vmem:[%s1370_s0 + $0x88] sm:$0xff]  ;;  %v906_v18 = vld [vmem:[%s1370_s0 + $0x90] sm:$0xff] }
   0x5   :  { %v912_v11 = vld [vmem:[%s1370_s0 + $0xc0] sm:$0xff]  ;;  %v913_v15 = vld [vmem:[%s1370_s0 + $0xc8] sm:$0xff]  ;;  %v914_v19 = vld [vmem:[%s1370_s0 + $0xd0] sm:$0xff] }
   0x6   :  { %361 = vmatpush.bf16.msra.mxu0 %v353_v6  ;;  %1113 = vmatpush.bf16.msra.mxu1 %v353_v6  ;;  %v891_v20 = vld [vmem:[%s1370_s0 + $0x18] sm:$0xff]  ;;  %v892_v24 = vld [vmem:[%s1370_s0 + $0x20] sm:$0xff]  ;;  %v893_v28 = vld [vmem:[%s1370_s0 + $0x28] sm:$0xff] }
   0x7   :  { %1114 = vmatpush.bf16.msra.mxu2 %v353_v6  ;;  %1115 = vmatpush.bf16.msra.mxu3 %v353_v6  ;;  %v899_v21 = vld [vmem:[%s1370_s0 + $0x58] sm:$0xff]  ;;  %v900_v25 = vld [vmem:[%s1370_s0 + $0x60] sm:$0xff]  ;;  %v901_v29 = vld [vmem:[%s1370_s0 + $0x68] sm:$0xff] }
   0x8   :  { %v907_v22 = vld [vmem:[%s1370_s0 + $0x98] sm:$0xff]  ;;  %v908_v26 = vld [vmem:[%s1370_s0 + $0xa0] sm:$0xff]  ;;  %v909_v30 = vld [vmem:[%s1370_s0 + $0xa8] sm:$0xff] }
   0x9   :  { %v915_v23 = vld [vmem:[%s1370_s0 + $0xd8] sm:$0xff]  ;;  %v916_v27 = vld [vmem:[%s1370_s0 + $0xe0] sm:$0xff]  ;;  %v917_v31 = vld [vmem:[%s1370_s0 + $0xe8] sm:$0xff] }
   0xa   :  { %362 = vmatpush.bf16.msra.mxu0 %v920_v7  ;;  %1116 = vmatpush.bf16.msra.mxu1 %v920_v7  ;;  %v894_v32 = vld [vmem:[%s1370_s0 + $0x30] sm:$0xff]  ;;  %v895_v36 = vld [vmem:[%s1370_s0 + $0x38] sm:$0xff] }
   0xb   :  { %1117 = vmatpush.bf16.msra.mxu2 %v920_v7  ;;  %1118 = vmatpush.bf16.msra.mxu3 %v920_v7  ;;  %v902_v33 = vld [vmem:[%s1370_s0 + $0x70] sm:$0xff]  ;;  %v903_v37 = vld [vmem:[%s1370_s0 + $0x78] sm:$0xff] }
   0xc   :  { %v910_v34 = vld [vmem:[%s1370_s0 + $0xb0] sm:$0xff]  ;;  %v911_v38 = vld [vmem:[%s1370_s0 + $0xb8] sm:$0xff] }
   0xd   :  { %856 = vmatmul.msk.bf16.vlgmr.msra.gmra.mxu0 %vm251_vm2, %v888_v8  ;;  %864 = vmatmul.msk.bf16.vlgmr.msra.gmra.mxu1 %vm251_vm2, %v896_v9  ;;  %v918_v35 = vld [vmem:[%s1370_s0 + $0xf0] sm:$0xff]  ;;  %v919_v39 = vld [vmem:[%s1370_s0 + $0xf8] sm:$0xff] }
   0xe   :  { %872 = vmatmul.msk.bf16.vlgmr.msra.gmra.mxu2 %vm251_vm2, %v904_v10  ;;  %880 = vmatmul.msk.bf16.vlgmr.msra.gmra.mxu3 %vm251_vm2, %v912_v11 }
  0x1d   :  { %857 = vmatmul.msk.bf16.gmra.mxu0 %vm251_vm2, %v889_v12  ;;  %865 = vmatmul.msk.bf16.gmra.mxu1 %vm251_vm2, %v897_v13 }
  0x1e   :  { %873 = vmatmul.msk.bf16.gmra.mxu2 %vm251_vm2, %v905_v14  ;;  %881 = vmatmul.msk.bf16.gmra.mxu3 %vm251_vm2, %v913_v15 }
  0x2d   :  { %858 = vmatmul.msk.bf16.gmra.mxu0 %vm251_vm2, %v890_v16  ;;  %866 = vmatmul.msk.bf16.gmra.mxu1 %vm251_vm2, %v898_v17 }
  0x2e   :  { %874 = vmatmul.msk.bf16.gmra.mxu2 %vm251_vm2, %v906_v18  ;;  %882 = vmatmul.msk.bf16.gmra.mxu3 %vm251_vm2, %v914_v19 }
  0x3d   :  { %859 = vmatmul.msk.bf16.gmra.mxu0 %vm251_vm2, %v891_v20  ;;  %867 = vmatmul.msk.bf16.gmra.mxu1 %vm251_vm2, %v899_v21 }
  0x3e   :  { %875 = vmatmul.msk.bf16.gmra.mxu2 %vm251_vm2, %v907_v22  ;;  %883 = vmatmul.msk.bf16.gmra.mxu3 %vm251_vm2, %v915_v23 }
  0x4d   :  { %860 = vmatmul.msk.bf16.gmra.mxu0 %vm251_vm2, %v892_v24  ;;  %868 = vmatmul.msk.bf16.gmra.mxu1 %vm251_vm2, %v900_v25 }
  0x4e   :  { %876 = vmatmul.msk.bf16.gmra.mxu2 %vm251_vm2, %v908_v26  ;;  %884 = vmatmul.msk.bf16.gmra.mxu3 %vm251_vm2, %v916_v27 }
  0x5d   :  { %861 = vmatmul.msk.bf16.gmra.mxu0 %vm251_vm2, %v893_v28  ;;  %869 = vmatmul.msk.bf16.gmra.mxu1 %vm251_vm2, %v901_v29 }
  0x5e   :  { %877 = vmatmul.msk.bf16.gmra.mxu2 %vm251_vm2, %v909_v30  ;;  %885 = vmatmul.msk.bf16.gmra.mxu3 %vm251_vm2, %v917_v31 }
  0x6d   :  { %862 = vmatmul.msk.bf16.gmra.mxu0 %vm251_vm2, %v894_v32  ;;  %870 = vmatmul.msk.bf16.gmra.mxu1 %vm251_vm2, %v902_v33 }
  0x6e   :  { %878 = vmatmul.msk.bf16.gmra.mxu2 %vm251_vm2, %v910_v34  ;;  %886 = vmatmul.msk.bf16.gmra.mxu3 %vm251_vm2, %v918_v35 }
  0x7d   :  { %863 = vmatmul.msk.bf16.gmra.mxu0 %vm251_vm2, %v895_v36  ;;  %871 = vmatmul.msk.bf16.gmra.mxu1 %vm251_vm2, %v903_v37 }
  0x7e   :  { %879 = vmatmul.msk.bf16.gmra.mxu2 %vm251_vm2, %v911_v38  ;;  %887 = vmatmul.msk.bf16.gmra.mxu3 %vm251_vm2, %v919_v39 }
  0x8a   :  { %v364_v40 = vpop.f32.mrf.mxu0  ;;  %v404_v41 = vpop.f32.mrf.mxu1 }
  0x8b   :  { %v524_v46 = vmax.f32 %v364_v40, 0.0  ;;  %v540_v47 = vmax.f32 %v404_v41, 0.0 }
  0x91   :  { %v444_v42 = vpop.f32.mrf.mxu2  ;;  %v484_v43 = vpop.f32.mrf.mxu3 }
  0x92   :  { %v366_v44 = vpop.f32.mrf.mxu0  ;;  %v406_v45 = vpop.f32.mrf.mxu1  ;;  %v556_v54 = vmax.f32 %v444_v42, 0.0  ;;  %v572_v55 = vmax.f32 %v484_v43, 0.0 }
  0x93   :  { %v525_v48 = vmax.f32 %v366_v44, 0.0  ;;  %v541_v49 = vmax.f32 %v406_v45, 0.0 }
  0x95   :  { %v925_v50 = vpack.c.bf16 %v525_v48, %v524_v46  ;;  %v965_v51 = vpack.c.bf16 %v541_v49, %v540_v47 }
  0x97   :  { %926 = vst [vmem:[%s1371_s2] sm:$0xff] %v925_v50  }
  0x98   :  { %1089 = vst [vmem:[%s1371_s2 + $0x40] sm:$0xff] %v965_v51  }
  0x99   :  { %v446_v52 = vpop.f32.mrf.mxu2  ;;  %v486_v53 = vpop.f32.mrf.mxu3 }
  0x9a   :  { %v557_v56 = vmax.f32 %v446_v52, 0.0  ;;  %v573_v57 = vmax.f32 %v486_v53, 0.0  ;;  %v369_v58 = vpop.f32.mrf.mxu0  ;;  %v409_v59 = vpop.f32.mrf.mxu1 }
  0x9b   :  { %v526_v2 = vmax.f32 %v369_v58, 0.0  ;;  %v542_v3 = vmax.f32 %v409_v59, 0.0 }
  0x9c   :  { %v1005_v60 = vpack.c.bf16 %v557_v56, %v556_v54  ;;  %v1045_v61 = vpack.c.bf16 %v573_v57, %v572_v55 }
  0x9e   :  { %1097 = vst [vmem:[%s1371_s2 + $0x80] sm:$0xff] %v1005_v60  }
  0x9f   :  { %1105 = vst [vmem:[%s1371_s2 + $0xc0] sm:$0xff] %v1045_v61  }
  0xa1   :  { %v449_v62 = vpop.f32.mrf.mxu2  ;;  %v489_v63 = vpop.f32.mrf.mxu3 }
  0xa2   :  { %v371_v0 = vpop.f32.mrf.mxu0  ;;  %v411_v1 = vpop.f32.mrf.mxu1  ;;  %v558_v10 = vmax.f32 %v449_v62, 0.0  ;;  %v574_v11 = vmax.f32 %v489_v63, 0.0 }
  0xa3   :  { %v527_v4 = vmax.f32 %v371_v0, 0.0  ;;  %v543_v5 = vmax.f32 %v411_v1, 0.0 }
  0xa5   :  { %v930_v6 = vpack.c.bf16 %v527_v4, %v526_v2  ;;  %v970_v7 = vpack.c.bf16 %v543_v5, %v542_v3 }
  0xa7   :  { %1082 = vst [vmem:[%s1371_s2 + $0x8] sm:$0xff] %v930_v6  }
  0xa8   :  { %1090 = vst [vmem:[%s1371_s2 + $0x48] sm:$0xff] %v970_v7  }
  0xa9   :  { %v451_v8 = vpop.f32.mrf.mxu2  ;;  %v491_v9 = vpop.f32.mrf.mxu3 }
  0xaa   :  { %v559_v12 = vmax.f32 %v451_v8, 0.0  ;;  %v575_v13 = vmax.f32 %v491_v9, 0.0  ;;  %v374_v14 = vpop.f32.mrf.mxu0  ;;  %v414_v15 = vpop.f32.mrf.mxu1 }
  0xab   :  { %v528_v22 = vmax.f32 %v374_v14, 0.0  ;;  %v544_v23 = vmax.f32 %v414_v15, 0.0 }
  0xac   :  { %v1010_v16 = vpack.c.bf16 %v559_v12, %v558_v10  ;;  %v1050_v17 = vpack.c.bf16 %v575_v13, %v574_v11 }
  0xae   :  { %1098 = vst [vmem:[%s1371_s2 + $0x88] sm:$0xff] %v1010_v16  }
  0xaf   :  { %1106 = vst [vmem:[%s1371_s2 + $0xc8] sm:$0xff] %v1050_v17  }
  0xb1   :  { %v454_v18 = vpop.f32.mrf.mxu2  ;;  %v494_v19 = vpop.f32.mrf.mxu3 }
  0xb2   :  { %v376_v20 = vpop.f32.mrf.mxu0  ;;  %v416_v21 = vpop.f32.mrf.mxu1  ;;  %v560_v30 = vmax.f32 %v454_v18, 0.0  ;;  %v576_v31 = vmax.f32 %v494_v19, 0.0 }
  0xb3   :  { %v529_v24 = vmax.f32 %v376_v20, 0.0  ;;  %v545_v25 = vmax.f32 %v416_v21, 0.0 }
  0xb5   :  { %v935_v26 = vpack.c.bf16 %v529_v24, %v528_v22  ;;  %v975_v27 = vpack.c.bf16 %v545_v25, %v544_v23 }
  0xb7   :  { %1083 = vst [vmem:[%s1371_s2 + $0x10] sm:$0xff] %v935_v26  }
  0xb8   :  { %1091 = vst [vmem:[%s1371_s2 + $0x50] sm:$0xff] %v975_v27  }
  0xb9   :  { %v456_v28 = vpop.f32.mrf.mxu2  ;;  %v496_v29 = vpop.f32.mrf.mxu3 }
  0xba   :  { %v561_v32 = vmax.f32 %v456_v28, 0.0  ;;  %v577_v33 = vmax.f32 %v496_v29, 0.0  ;;  %v379_v34 = vpop.f32.mrf.mxu0  ;;  %v419_v35 = vpop.f32.mrf.mxu1 }
  0xbb   :  { %v530_v42 = vmax.f32 %v379_v34, 0.0  ;;  %v546_v43 = vmax.f32 %v419_v35, 0.0 }
  0xbc   :  { %v1015_v36 = vpack.c.bf16 %v561_v32, %v560_v30  ;;  %v1055_v37 = vpack.c.bf16 %v577_v33, %v576_v31 }
  0xbe   :  { %1099 = vst [vmem:[%s1371_s2 + $0x90] sm:$0xff] %v1015_v36  }
  0xbf   :  { %1107 = vst [vmem:[%s1371_s2 + $0xd0] sm:$0xff] %v1055_v37  }
  0xc1   :  { %v459_v38 = vpop.f32.mrf.mxu2  ;;  %v499_v39 = vpop.f32.mrf.mxu3 }
  0xc2   :  { %v381_v40 = vpop.f32.mrf.mxu0  ;;  %v421_v41 = vpop.f32.mrf.mxu1  ;;  %v562_v50 = vmax.f32 %v459_v38, 0.0  ;;  %v578_v51 = vmax.f32 %v499_v39, 0.0 }
  0xc3   :  { %v531_v44 = vmax.f32 %v381_v40, 0.0  ;;  %v547_v45 = vmax.f32 %v421_v41, 0.0 }
  0xc5   :  { %v940_v46 = vpack.c.bf16 %v531_v44, %v530_v42  ;;  %v980_v47 = vpack.c.bf16 %v547_v45, %v546_v43 }
  0xc7   :  { %1084 = vst [vmem:[%s1371_s2 + $0x18] sm:$0xff] %v940_v46  }
  0xc8   :  { %1092 = vst [vmem:[%s1371_s2 + $0x58] sm:$0xff] %v980_v47  }
  0xc9   :  { %v461_v48 = vpop.f32.mrf.mxu2  ;;  %v501_v49 = vpop.f32.mrf.mxu3 }
  0xca   :  { %v563_v52 = vmax.f32 %v461_v48, 0.0  ;;  %v579_v53 = vmax.f32 %v501_v49, 0.0  ;;  %v384_v54 = vpop.f32.mrf.mxu0  ;;  %v424_v55 = vpop.f32.mrf.mxu1 }
  0xcb   :  { %v532_v62 = vmax.f32 %v384_v54, 0.0  ;;  %v548_v63 = vmax.f32 %v424_v55, 0.0 }
  0xcc   :  { %v1020_v56 = vpack.c.bf16 %v563_v52, %v562_v50  ;;  %v1060_v57 = vpack.c.bf16 %v579_v53, %v578_v51 }
  0xce   :  { %1100 = vst [vmem:[%s1371_s2 + $0x98] sm:$0xff] %v1020_v56  }
  0xcf   :  { %1108 = vst [vmem:[%s1371_s2 + $0xd8] sm:$0xff] %v1060_v57  }
  0xd1   :  { %v464_v58 = vpop.f32.mrf.mxu2  ;;  %v504_v59 = vpop.f32.mrf.mxu3 }
  0xd2   :  { %v386_v60 = vpop.f32.mrf.mxu0  ;;  %v426_v61 = vpop.f32.mrf.mxu1  ;;  %v564_v6 = vmax.f32 %v464_v58, 0.0  ;;  %v580_v7 = vmax.f32 %v504_v59, 0.0 }
  0xd3   :  { %v533_v0 = vmax.f32 %v386_v60, 0.0  ;;  %v549_v1 = vmax.f32 %v426_v61, 0.0 }
  0xd5   :  { %v945_v2 = vpack.c.bf16 %v533_v0, %v532_v62  ;;  %v985_v3 = vpack.c.bf16 %v549_v1, %v548_v63 }
  0xd7   :  { %1085 = vst [vmem:[%s1371_s2 + $0x20] sm:$0xff] %v945_v2  }
  0xd8   :  { %1093 = vst [vmem:[%s1371_s2 + $0x60] sm:$0xff] %v985_v3  }
  0xd9   :  { %v466_v4 = vpop.f32.mrf.mxu2  ;;  %v506_v5 = vpop.f32.mrf.mxu3 }
  0xda   :  { %v565_v8 = vmax.f32 %v466_v4, 0.0  ;;  %v581_v9 = vmax.f32 %v506_v5, 0.0  ;;  %v389_v10 = vpop.f32.mrf.mxu0  ;;  %v429_v11 = vpop.f32.mrf.mxu1 }
  0xdb   :  { %v534_v18 = vmax.f32 %v389_v10, 0.0  ;;  %v550_v19 = vmax.f32 %v429_v11, 0.0 }
  0xdc   :  { %v1025_v12 = vpack.c.bf16 %v565_v8, %v564_v6  ;;  %v1065_v13 = vpack.c.bf16 %v581_v9, %v580_v7 }
  0xde   :  { %1101 = vst [vmem:[%s1371_s2 + $0xa0] sm:$0xff] %v1025_v12  }
  0xdf   :  { %1109 = vst [vmem:[%s1371_s2 + $0xe0] sm:$0xff] %v1065_v13  }
  0xe1   :  { %v469_v14 = vpop.f32.mrf.mxu2  ;;  %v509_v15 = vpop.f32.mrf.mxu3 }
  0xe2   :  { %v391_v16 = vpop.f32.mrf.mxu0  ;;  %v431_v17 = vpop.f32.mrf.mxu1  ;;  %v566_v26 = vmax.f32 %v469_v14, 0.0  ;;  %v582_v27 = vmax.f32 %v509_v15, 0.0 }
  0xe3   :  { %v535_v20 = vmax.f32 %v391_v16, 0.0  ;;  %v551_v21 = vmax.f32 %v431_v17, 0.0 }
  0xe5   :  { %v950_v22 = vpack.c.bf16 %v535_v20, %v534_v18  ;;  %v990_v23 = vpack.c.bf16 %v551_v21, %v550_v19 }
  0xe7   :  { %1086 = vst [vmem:[%s1371_s2 + $0x28] sm:$0xff] %v950_v22  }
  0xe8   :  { %1094 = vst [vmem:[%s1371_s2 + $0x68] sm:$0xff] %v990_v23  }
  0xe9   :  { %v471_v24 = vpop.f32.mrf.mxu2  ;;  %v511_v25 = vpop.f32.mrf.mxu3 }
  0xea   :  { %v567_v28 = vmax.f32 %v471_v24, 0.0  ;;  %v583_v29 = vmax.f32 %v511_v25, 0.0  ;;  %v394_v30 = vpop.f32.mrf.mxu0  ;;  %v434_v31 = vpop.f32.mrf.mxu1 }
  0xeb   :  { %v536_v38 = vmax.f32 %v394_v30, 0.0  ;;  %v552_v39 = vmax.f32 %v434_v31, 0.0 }
  0xec   :  { %v1030_v32 = vpack.c.bf16 %v567_v28, %v566_v26  ;;  %v1070_v33 = vpack.c.bf16 %v583_v29, %v582_v27 }
  0xee   :  { %1102 = vst [vmem:[%s1371_s2 + $0xa8] sm:$0xff] %v1030_v32  }
  0xef   :  { %1110 = vst [vmem:[%s1371_s2 + $0xe8] sm:$0xff] %v1070_v33  }
  0xf1   :  { %v474_v34 = vpop.f32.mrf.mxu2  ;;  %v514_v35 = vpop.f32.mrf.mxu3 }
  0xf2   :  { %v396_v36 = vpop.f32.mrf.mxu0  ;;  %v436_v37 = vpop.f32.mrf.mxu1  ;;  %v568_v46 = vmax.f32 %v474_v34, 0.0  ;;  %v584_v47 = vmax.f32 %v514_v35, 0.0 }
  0xf3   :  { %v537_v40 = vmax.f32 %v396_v36, 0.0  ;;  %v553_v41 = vmax.f32 %v436_v37, 0.0 }
  0xf5   :  { %v955_v42 = vpack.c.bf16 %v537_v40, %v536_v38  ;;  %v995_v43 = vpack.c.bf16 %v553_v41, %v552_v39 }
  0xf7   :  { %1087 = vst [vmem:[%s1371_s2 + $0x30] sm:$0xff] %v955_v42  }
  0xf8   :  { %1095 = vst [vmem:[%s1371_s2 + $0x70] sm:$0xff] %v995_v43  }
  0xf9   :  { %v476_v44 = vpop.f32.mrf.mxu2  ;;  %v516_v45 = vpop.f32.mrf.mxu3 }
  0xfa   :  { %v569_v48 = vmax.f32 %v476_v44, 0.0  ;;  %v585_v49 = vmax.f32 %v516_v45, 0.0  ;;  %v399_v50 = vpop.f32.mrf.mxu0  ;;  %v439_v51 = vpop.f32.mrf.mxu1 }
  0xfb   :  { %v538_v58 = vmax.f32 %v399_v50, 0.0  ;;  %v554_v59 = vmax.f32 %v439_v51, 0.0 }
  0xfc   :  { %v1035_v52 = vpack.c.bf16 %v569_v48, %v568_v46  ;;  %v1075_v53 = vpack.c.bf16 %v585_v49, %v584_v47 }
  0xfe   :  { %1103 = vst [vmem:[%s1371_s2 + $0xb0] sm:$0xff] %v1035_v52  }
  0xff   :  { %1111 = vst [vmem:[%s1371_s2 + $0xf0] sm:$0xff] %v1075_v53  }
 0x101   :  { %v479_v54 = vpop.f32.mrf.mxu2  ;;  %v519_v55 = vpop.f32.mrf.mxu3 }
 0x102   :  { %v401_v56 = vpop.f32.mrf.mxu0  ;;  %v441_v57 = vpop.f32.mrf.mxu1  ;;  %v570_v2 = vmax.f32 %v479_v54, 0.0  ;;  %v586_v3 = vmax.f32 %v519_v55, 0.0 }
 0x103   :  { %v539_v60 = vmax.f32 %v401_v56, 0.0  ;;  %v555_v61 = vmax.f32 %v441_v57, 0.0 }
 0x105   :  { %v960_v62 = vpack.c.bf16 %v539_v60, %v538_v58  ;;  %v1000_v63 = vpack.c.bf16 %v555_v61, %v554_v59 }
 0x107   :  { %1088 = vst [vmem:[%s1371_s2 + $0x38] sm:$0xff] %v960_v62  }
 0x108   :  { %1096 = vst [vmem:[%s1371_s2 + $0x78] sm:$0xff] %v1000_v63  }
 0x109   :  { %v481_v0 = vpop.f32.mrf.mxu2  ;;  %v521_v1 = vpop.f32.mrf.mxu3 }
 0x10a   :  { %v571_v4 = vmax.f32 %v481_v0, 0.0  ;;  %v587_v5 = vmax.f32 %v521_v1, 0.0 }
 0x10c   :  { %v1040_v6 = vpack.c.bf16 %v571_v4, %v570_v2  ;;  %v1080_v7 = vpack.c.bf16 %v587_v5, %v586_v3 }
 0x10e   :  { %1104 = vst [vmem:[%s1371_s2 + $0xb8] sm:$0xff] %v1040_v6  }
 0x10f   :  { %1112 = vst [vmem:[%s1371_s2 + $0xf8] sm:$0xff] %v1080_v7  }

// kernel: skip_adaptor_forward.6
= control target key start
LH: loop header
LB: loop body
LE: loop exit
PB: predicated region body
PF: predicated region fallthrough
CT: control target
= control target key end

     0   :  { %vm369_vm0 = vcmask 1043456   ;;  %vm272_vm1 = vcmask 588800   ;;  %s1410_s1 = inlined_call_operand.vmem [shape: bf16[72,128], index: 1, kind: input, shape index: {}]   ;;  %s1411_s0 = inlined_call_operand.vmem [shape: bf16[512,72], index: 0, kind: input, shape index: {}]   ;;  %s1412_s2 = inlined_call_operand.vmem [shape: bf16[512,128], index: 2, kind: output, shape index: {}]  }
   0x1   :  { %v84_v0 = vld [vmem:[%s1410_s1 + $0x20] sm:$0xf]  ;;  %v949_v4 = vld [vmem:[%s1410_s1 + $0x18] sm:$0xff]  ;;  %v948_v5 = vld [vmem:[%s1410_s1 + $0x10] sm:$0xff] }
   0x2   :  { %v262_v1 = vunpack.c.l.b16 %v84_v0  ;;  %v947_v6 = vld [vmem:[%s1410_s1 + $0x8] sm:$0xff]  ;;  %v946_v7 = vld [vmem:[%s1410_s1] sm:$0xff]  ;;  %v916_v16 = vld [vmem:[%s1411_s0 + $0x10] sm:$0xff] }
   0x3   :  { %v914_v8 = vld [vmem:[%s1411_s0] sm:$0xff]  ;;  %v915_v12 = vld [vmem:[%s1411_s0 + $0x8] sm:$0xff]  ;;  %v924_v17 = vld [vmem:[%s1411_s0 + $0x50] sm:$0xff] }
   0x4   :  { %v267_v2 = vpack.c.b16 %v262_v1, %v262_v1  ;;  %v922_v9 = vld [vmem:[%s1411_s0 + $0x40] sm:$0xff]  ;;  %v923_v13 = vld [vmem:[%s1411_s0 + $0x48] sm:$0xff]  ;;  %v932_v18 = vld [vmem:[%s1411_s0 + $0x90] sm:$0xff] }
   0x5   :  { %v930_v10 = vld [vmem:[%s1411_s0 + $0x80] sm:$0xff]  ;;  %v931_v14 = vld [vmem:[%s1411_s0 + $0x88] sm:$0xff]  ;;  %v940_v19 = vld [vmem:[%s1411_s0 + $0xd0] sm:$0xff] }
   0x6   :  { %v371_v3 = vsel %vm369_vm0, %v267_v2, 0  ;;  %v938_v11 = vld [vmem:[%s1411_s0 + $0xc0] sm:$0xff]  ;;  %v939_v15 = vld [vmem:[%s1411_s0 + $0xc8] sm:$0xff]  ;;  %v917_v20 = vld [vmem:[%s1411_s0 + $0x18] sm:$0xff] }
   0x7   :  { %376 = vmatpush.bf16.msra.mxu0 %v371_v3  ;;  %1141 = vmatpush.bf16.msra.mxu1 %v371_v3  ;;  %v925_v21 = vld [vmem:[%s1411_s0 + $0x58] sm:$0xff]  ;;  %v918_v24 = vld [vmem:[%s1411_s0 + $0x20] sm:$0xff]  ;;  %v919_v28 = vld [vmem:[%s1411_s0 + $0x28] sm:$0xff] }
   0x8   :  { %1142 = vmatpush.bf16.msra.mxu2 %v371_v3  ;;  %1143 = vmatpush.bf16.msra.mxu3 %v371_v3  ;;  %v933_v22 = vld [vmem:[%s1411_s0 + $0x98] sm:$0xff]  ;;  %v926_v25 = vld [vmem:[%s1411_s0 + $0x60] sm:$0xff]  ;;  %v927_v29 = vld [vmem:[%s1411_s0 + $0x68] sm:$0xff] }
   0x9   :  { %v941_v23 = vld [vmem:[%s1411_s0 + $0xd8] sm:$0xff]  ;;  %v934_v26 = vld [vmem:[%s1411_s0 + $0xa0] sm:$0xff]  ;;  %v935_v30 = vld [vmem:[%s1411_s0 + $0xa8] sm:$0xff] }
   0xa   :  { %v942_v27 = vld [vmem:[%s1411_s0 + $0xe0] sm:$0xff]  ;;  %v943_v31 = vld [vmem:[%s1411_s0 + $0xe8] sm:$0xff]  ;;  %v920_v32 = vld [vmem:[%s1411_s0 + $0x30] sm:$0xff] }
   0xb   :  { %377 = vmatpush.bf16.msra.mxu0 %v949_v4  ;;  %1144 = vmatpush.bf16.msra.mxu1 %v949_v4  ;;  %v928_v33 = vld [vmem:[%s1411_s0 + $0x70] sm:$0xff]  ;;  %v921_v36 = vld [vmem:[%s1411_s0 + $0x38] sm:$0xff] }
   0xc   :  { %1145 = vmatpush.bf16.msra.mxu2 %v949_v4  ;;  %1146 = vmatpush.bf16.msra.mxu3 %v949_v4  ;;  %v936_v34 = vld [vmem:[%s1411_s0 + $0xb0] sm:$0xff]  ;;  %v929_v37 = vld [vmem:[%s1411_s0 + $0x78] sm:$0xff] }
   0xd   :  { %v944_v35 = vld [vmem:[%s1411_s0 + $0xf0] sm:$0xff]  ;;  %v937_v38 = vld [vmem:[%s1411_s0 + $0xb8] sm:$0xff] }
   0xe   :  { %v945_v39 = vld [vmem:[%s1411_s0 + $0xf8] sm:$0xff] }
   0xf   :  { %378 = vmatpush.bf16.msra.mxu0 %v948_v5  ;;  %1147 = vmatpush.bf16.msra.mxu1 %v948_v5 }
  0x10   :  { %1148 = vmatpush.bf16.msra.mxu2 %v948_v5  ;;  %1149 = vmatpush.bf16.msra.mxu3 %v948_v5 }
  0x13   :  { %379 = vmatpush.bf16.msra.mxu0 %v947_v6  ;;  %1150 = vmatpush.bf16.msra.mxu1 %v947_v6 }
  0x14   :  { %1151 = vmatpush.bf16.msra.mxu2 %v947_v6  ;;  %1152 = vmatpush.bf16.msra.mxu3 %v947_v6 }
  0x17   :  { %380 = vmatpush.bf16.msra.mxu0 %v946_v7  ;;  %1153 = vmatpush.bf16.msra.mxu1 %v946_v7 }
  0x18   :  { %1154 = vmatpush.bf16.msra.mxu2 %v946_v7  ;;  %1155 = vmatpush.bf16.msra.mxu3 %v946_v7 }
  0x1a   :  { %882 = vmatmul.msk.bf16.vlgmr.msra.gmra.mxu0 %vm272_vm1, %v914_v8  ;;  %890 = vmatmul.msk.bf16.vlgmr.msra.gmra.mxu1 %vm272_vm1, %v922_v9 }
  0x1b   :  { %898 = vmatmul.msk.bf16.vlgmr.msra.gmra.mxu2 %vm272_vm1, %v930_v10  ;;  %906 = vmatmul.msk.bf16.vlgmr.msra.gmra.mxu3 %vm272_vm1, %v938_v11 }
  0x2a   :  { %883 = vmatmul.msk.bf16.gmra.mxu0 %vm272_vm1, %v915_v12  ;;  %891 = vmatmul.msk.bf16.gmra.mxu1 %vm272_vm1, %v923_v13 }
  0x2b   :  { %899 = vmatmul.msk.bf16.gmra.mxu2 %vm272_vm1, %v931_v14  ;;  %907 = vmatmul.msk.bf16.gmra.mxu3 %vm272_vm1, %v939_v15 }
  0x3a   :  { %884 = vmatmul.msk.bf16.gmra.mxu0 %vm272_vm1, %v916_v16  ;;  %892 = vmatmul.msk.bf16.gmra.mxu1 %vm272_vm1, %v924_v17 }
  0x3b   :  { %900 = vmatmul.msk.bf16.gmra.mxu2 %vm272_vm1, %v932_v18  ;;  %908 = vmatmul.msk.bf16.gmra.mxu3 %vm272_vm1, %v940_v19 }
  0x4a   :  { %885 = vmatmul.msk.bf16.gmra.mxu0 %vm272_vm1, %v917_v20  ;;  %893 = vmatmul.msk.bf16.gmra.mxu1 %vm272_vm1, %v925_v21 }
  0x4b   :  { %901 = vmatmul.msk.bf16.gmra.mxu2 %vm272_vm1, %v933_v22  ;;  %909 = vmatmul.msk.bf16.gmra.mxu3 %vm272_vm1, %v941_v23 }
  0x5a   :  { %886 = vmatmul.msk.bf16.gmra.mxu0 %vm272_vm1, %v918_v24  ;;  %894 = vmatmul.msk.bf16.gmra.mxu1 %vm272_vm1, %v926_v25 }
  0x5b   :  { %902 = vmatmul.msk.bf16.gmra.mxu2 %vm272_vm1, %v934_v26  ;;  %910 = vmatmul.msk.bf16.gmra.mxu3 %vm272_vm1, %v942_v27 }
  0x6a   :  { %887 = vmatmul.msk.bf16.gmra.mxu0 %vm272_vm1, %v919_v28  ;;  %895 = vmatmul.msk.bf16.gmra.mxu1 %vm272_vm1, %v927_v29 }
  0x6b   :  { %903 = vmatmul.msk.bf16.gmra.mxu2 %vm272_vm1, %v935_v30  ;;  %911 = vmatmul.msk.bf16.gmra.mxu3 %vm272_vm1, %v943_v31 }
  0x7a   :  { %888 = vmatmul.msk.bf16.gmra.mxu0 %vm272_vm1, %v920_v32  ;;  %896 = vmatmul.msk.bf16.gmra.mxu1 %vm272_vm1, %v928_v33 }
  0x7b   :  { %904 = vmatmul.msk.bf16.gmra.mxu2 %vm272_vm1, %v936_v34  ;;  %912 = vmatmul.msk.bf16.gmra.mxu3 %vm272_vm1, %v944_v35 }
  0x8a   :  { %889 = vmatmul.msk.bf16.gmra.mxu0 %vm272_vm1, %v921_v36  ;;  %897 = vmatmul.msk.bf16.gmra.mxu1 %vm272_vm1, %v929_v37 }
  0x8b   :  { %905 = vmatmul.msk.bf16.gmra.mxu2 %vm272_vm1, %v937_v38  ;;  %913 = vmatmul.msk.bf16.gmra.mxu3 %vm272_vm1, %v945_v39 }
  0x97   :  { %v382_v40 = vpop.f32.mrf.mxu0  ;;  %v422_v41 = vpop.f32.mrf.mxu1 }
  0x98   :  { %v542_v46 = vmax.f32 %v382_v40, 0.0  ;;  %v558_v47 = vmax.f32 %v422_v41, 0.0 }
  0x9e   :  { %v462_v42 = vpop.f32.mrf.mxu2  ;;  %v502_v43 = vpop.f32.mrf.mxu3 }
  0x9f   :  { %v384_v44 = vpop.f32.mrf.mxu0  ;;  %v424_v45 = vpop.f32.mrf.mxu1  ;;  %v574_v54 = vmax.f32 %v462_v42, 0.0  ;;  %v590_v55 = vmax.f32 %v502_v43, 0.0 }
  0xa0   :  { %v543_v48 = vmax.f32 %v384_v44, 0.0  ;;  %v559_v49 = vmax.f32 %v424_v45, 0.0 }
  0xa2   :  { %v953_v50 = vpack.c.bf16 %v543_v48, %v542_v46  ;;  %v993_v51 = vpack.c.bf16 %v559_v49, %v558_v47 }
  0xa4   :  { %954 = vst [vmem:[%s1412_s2] sm:$0xff] %v953_v50  }
  0xa5   :  { %1117 = vst [vmem:[%s1412_s2 + $0x40] sm:$0xff] %v993_v51  }
  0xa6   :  { %v464_v52 = vpop.f32.mrf.mxu2  ;;  %v504_v53 = vpop.f32.mrf.mxu3 }
  0xa7   :  { %v575_v56 = vmax.f32 %v464_v52, 0.0  ;;  %v591_v57 = vmax.f32 %v504_v53, 0.0  ;;  %v387_v58 = vpop.f32.mrf.mxu0  ;;  %v427_v59 = vpop.f32.mrf.mxu1 }
  0xa8   :  { %v544_v2 = vmax.f32 %v387_v58, 0.0  ;;  %v560_v3 = vmax.f32 %v427_v59, 0.0 }
  0xa9   :  { %v1033_v60 = vpack.c.bf16 %v575_v56, %v574_v54  ;;  %v1073_v61 = vpack.c.bf16 %v591_v57, %v590_v55 }
  0xab   :  { %1125 = vst [vmem:[%s1412_s2 + $0x80] sm:$0xff] %v1033_v60  }
  0xac   :  { %1133 = vst [vmem:[%s1412_s2 + $0xc0] sm:$0xff] %v1073_v61  }
  0xae   :  { %v467_v62 = vpop.f32.mrf.mxu2  ;;  %v507_v63 = vpop.f32.mrf.mxu3 }
  0xaf   :  { %v389_v0 = vpop.f32.mrf.mxu0  ;;  %v429_v1 = vpop.f32.mrf.mxu1  ;;  %v576_v10 = vmax.f32 %v467_v62, 0.0  ;;  %v592_v11 = vmax.f32 %v507_v63, 0.0 }
  0xb0   :  { %v545_v4 = vmax.f32 %v389_v0, 0.0  ;;  %v561_v5 = vmax.f32 %v429_v1, 0.0 }
  0xb2   :  { %v958_v6 = vpack.c.bf16 %v545_v4, %v544_v2  ;;  %v998_v7 = vpack.c.bf16 %v561_v5, %v560_v3 }
  0xb4   :  { %1110 = vst [vmem:[%s1412_s2 + $0x8] sm:$0xff] %v958_v6  }
  0xb5   :  { %1118 = vst [vmem:[%s1412_s2 + $0x48] sm:$0xff] %v998_v7  }
  0xb6   :  { %v469_v8 = vpop.f32.mrf.mxu2  ;;  %v509_v9 = vpop.f32.mrf.mxu3 }
  0xb7   :  { %v577_v12 = vmax.f32 %v469_v8, 0.0  ;;  %v593_v13 = vmax.f32 %v509_v9, 0.0  ;;  %v392_v14 = vpop.f32.mrf.mxu0  ;;  %v432_v15 = vpop.f32.mrf.mxu1 }
  0xb8   :  { %v546_v22 = vmax.f32 %v392_v14, 0.0  ;;  %v562_v23 = vmax.f32 %v432_v15, 0.0 }
  0xb9   :  { %v1038_v16 = vpack.c.bf16 %v577_v12, %v576_v10  ;;  %v1078_v17 = vpack.c.bf16 %v593_v13, %v592_v11 }
  0xbb   :  { %1126 = vst [vmem:[%s1412_s2 + $0x88] sm:$0xff] %v1038_v16  }
  0xbc   :  { %1134 = vst [vmem:[%s1412_s2 + $0xc8] sm:$0xff] %v1078_v17  }
  0xbe   :  { %v472_v18 = vpop.f32.mrf.mxu2  ;;  %v512_v19 = vpop.f32.mrf.mxu3 }
  0xbf   :  { %v394_v20 = vpop.f32.mrf.mxu0  ;;  %v434_v21 = vpop.f32.mrf.mxu1  ;;  %v578_v30 = vmax.f32 %v472_v18, 0.0  ;;  %v594_v31 = vmax.f32 %v512_v19, 0.0 }
  0xc0   :  { %v547_v24 = vmax.f32 %v394_v20, 0.0  ;;  %v563_v25 = vmax.f32 %v434_v21, 0.0 }
  0xc2   :  { %v963_v26 = vpack.c.bf16 %v547_v24, %v546_v22  ;;  %v1003_v27 = vpack.c.bf16 %v563_v25, %v562_v23 }
  0xc4   :  { %1111 = vst [vmem:[%s1412_s2 + $0x10] sm:$0xff] %v963_v26  }
  0xc5   :  { %1119 = vst [vmem:[%s1412_s2 + $0x50] sm:$0xff] %v1003_v27  }
  0xc6   :  { %v474_v28 = vpop.f32.mrf.mxu2  ;;  %v514_v29 = vpop.f32.mrf.mxu3 }
  0xc7   :  { %v579_v32 = vmax.f32 %v474_v28, 0.0  ;;  %v595_v33 = vmax.f32 %v514_v29, 0.0  ;;  %v397_v34 = vpop.f32.mrf.mxu0  ;;  %v437_v35 = vpop.f32.mrf.mxu1 }
  0xc8   :  { %v548_v42 = vmax.f32 %v397_v34, 0.0  ;;  %v564_v43 = vmax.f32 %v437_v35, 0.0 }
  0xc9   :  { %v1043_v36 = vpack.c.bf16 %v579_v32, %v578_v30  ;;  %v1083_v37 = vpack.c.bf16 %v595_v33, %v594_v31 }
  0xcb   :  { %1127 = vst [vmem:[%s1412_s2 + $0x90] sm:$0xff] %v1043_v36  }
  0xcc   :  { %1135 = vst [vmem:[%s1412_s2 + $0xd0] sm:$0xff] %v1083_v37  }
  0xce   :  { %v477_v38 = vpop.f32.mrf.mxu2  ;;  %v517_v39 = vpop.f32.mrf.mxu3 }
  0xcf   :  { %v399_v40 = vpop.f32.mrf.mxu0  ;;  %v439_v41 = vpop.f32.mrf.mxu1  ;;  %v580_v50 = vmax.f32 %v477_v38, 0.0  ;;  %v596_v51 = vmax.f32 %v517_v39, 0.0 }
  0xd0   :  { %v549_v44 = vmax.f32 %v399_v40, 0.0  ;;  %v565_v45 = vmax.f32 %v439_v41, 0.0 }
  0xd2   :  { %v968_v46 = vpack.c.bf16 %v549_v44, %v548_v42  ;;  %v1008_v47 = vpack.c.bf16 %v565_v45, %v564_v43 }
  0xd4   :  { %1112 = vst [vmem:[%s1412_s2 + $0x18] sm:$0xff] %v968_v46  }
  0xd5   :  { %1120 = vst [vmem:[%s1412_s2 + $0x58] sm:$0xff] %v1008_v47  }
  0xd6   :  { %v479_v48 = vpop.f32.mrf.mxu2  ;;  %v519_v49 = vpop.f32.mrf.mxu3 }
  0xd7   :  { %v581_v52 = vmax.f32 %v479_v48, 0.0  ;;  %v597_v53 = vmax.f32 %v519_v49, 0.0  ;;  %v402_v54 = vpop.f32.mrf.mxu0  ;;  %v442_v55 = vpop.f32.mrf.mxu1 }
  0xd8   :  { %v550_v62 = vmax.f32 %v402_v54, 0.0  ;;  %v566_v63 = vmax.f32 %v442_v55, 0.0 }
  0xd9   :  { %v1048_v56 = vpack.c.bf16 %v581_v52, %v580_v50  ;;  %v1088_v57 = vpack.c.bf16 %v597_v53, %v596_v51 }
  0xdb   :  { %1128 = vst [vmem:[%s1412_s2 + $0x98] sm:$0xff] %v1048_v56  }
  0xdc   :  { %1136 = vst [vmem:[%s1412_s2 + $0xd8] sm:$0xff] %v1088_v57  }
  0xde   :  { %v482_v58 = vpop.f32.mrf.mxu2  ;;  %v522_v59 = vpop.f32.mrf.mxu3 }
  0xdf   :  { %v404_v60 = vpop.f32.mrf.mxu0  ;;  %v444_v61 = vpop.f32.mrf.mxu1  ;;  %v582_v6 = vmax.f32 %v482_v58, 0.0  ;;  %v598_v7 = vmax.f32 %v522_v59, 0.0 }
  0xe0   :  { %v551_v0 = vmax.f32 %v404_v60, 0.0  ;;  %v567_v1 = vmax.f32 %v444_v61, 0.0 }
  0xe2   :  { %v973_v2 = vpack.c.bf16 %v551_v0, %v550_v62  ;;  %v1013_v3 = vpack.c.bf16 %v567_v1, %v566_v63 }
  0xe4   :  { %1113 = vst [vmem:[%s1412_s2 + $0x20] sm:$0xff] %v973_v2  }
  0xe5   :  { %1121 = vst [vmem:[%s1412_s2 + $0x60] sm:$0xff] %v1013_v3  }
  0xe6   :  { %v484_v4 = vpop.f32.mrf.mxu2  ;;  %v524_v5 = vpop.f32.mrf.mxu3 }
  0xe7   :  { %v583_v8 = vmax.f32 %v484_v4, 0.0  ;;  %v599_v9 = vmax.f32 %v524_v5, 0.0  ;;  %v407_v10 = vpop.f32.mrf.mxu0  ;;  %v447_v11 = vpop.f32.mrf.mxu1 }
  0xe8   :  { %v552_v18 = vmax.f32 %v407_v10, 0.0  ;;  %v568_v19 = vmax.f32 %v447_v11, 0.0 }
  0xe9   :  { %v1053_v12 = vpack.c.bf16 %v583_v8, %v582_v6  ;;  %v1093_v13 = vpack.c.bf16 %v599_v9, %v598_v7 }
  0xeb   :  { %1129 = vst [vmem:[%s1412_s2 + $0xa0] sm:$0xff] %v1053_v12  }
  0xec   :  { %1137 = vst [vmem:[%s1412_s2 + $0xe0] sm:$0xff] %v1093_v13  }
  0xee   :  { %v487_v14 = vpop.f32.mrf.mxu2  ;;  %v527_v15 = vpop.f32.mrf.mxu3 }
  0xef   :  { %v409_v16 = vpop.f32.mrf.mxu0  ;;  %v449_v17 = vpop.f32.mrf.mxu1  ;;  %v584_v26 = vmax.f32 %v487_v14, 0.0  ;;  %v600_v27 = vmax.f32 %v527_v15, 0.0 }
  0xf0   :  { %v553_v20 = vmax.f32 %v409_v16, 0.0  ;;  %v569_v21 = vmax.f32 %v449_v17, 0.0 }
  0xf2   :  { %v978_v22 = vpack.c.bf16 %v553_v20, %v552_v18  ;;  %v1018_v23 = vpack.c.bf16 %v569_v21, %v568_v19 }
  0xf4   :  { %1114 = vst [vmem:[%s1412_s2 + $0x28] sm:$0xff] %v978_v22  }
  0xf5   :  { %1122 = vst [vmem:[%s1412_s2 + $0x68] sm:$0xff] %v1018_v23  }
  0xf6   :  { %v489_v24 = vpop.f32.mrf.mxu2  ;;  %v529_v25 = vpop.f32.mrf.mxu3 }
  0xf7   :  { %v585_v28 = vmax.f32 %v489_v24, 0.0  ;;  %v601_v29 = vmax.f32 %v529_v25, 0.0  ;;  %v412_v30 = vpop.f32.mrf.mxu0  ;;  %v452_v31 = vpop.f32.mrf.mxu1 }
  0xf8   :  { %v554_v38 = vmax.f32 %v412_v30, 0.0  ;;  %v570_v39 = vmax.f32 %v452_v31, 0.0 }
  0xf9   :  { %v1058_v32 = vpack.c.bf16 %v585_v28, %v584_v26  ;;  %v1098_v33 = vpack.c.bf16 %v601_v29, %v600_v27 }
  0xfb   :  { %1130 = vst [vmem:[%s1412_s2 + $0xa8] sm:$0xff] %v1058_v32  }
  0xfc   :  { %1138 = vst [vmem:[%s1412_s2 + $0xe8] sm:$0xff] %v1098_v33  }
  0xfe   :  { %v492_v34 = vpop.f32.mrf.mxu2  ;;  %v532_v35 = vpop.f32.mrf.mxu3 }
  0xff   :  { %v414_v36 = vpop.f32.mrf.mxu0  ;;  %v454_v37 = vpop.f32.mrf.mxu1  ;;  %v586_v46 = vmax.f32 %v492_v34, 0.0  ;;  %v602_v47 = vmax.f32 %v532_v35, 0.0 }
 0x100   :  { %v555_v40 = vmax.f32 %v414_v36, 0.0  ;;  %v571_v41 = vmax.f32 %v454_v37, 0.0 }
 0x102   :  { %v983_v42 = vpack.c.bf16 %v555_v40, %v554_v38  ;;  %v1023_v43 = vpack.c.bf16 %v571_v41, %v570_v39 }
 0x104   :  { %1115 = vst [vmem:[%s1412_s2 + $0x30] sm:$0xff] %v983_v42  }
 0x105   :  { %1123 = vst [vmem:[%s1412_s2 + $0x70] sm:$0xff] %v1023_v43  }
 0x106   :  { %v494_v44 = vpop.f32.mrf.mxu2  ;;  %v534_v45 = vpop.f32.mrf.mxu3 }
 0x107   :  { %v587_v48 = vmax.f32 %v494_v44, 0.0  ;;  %v603_v49 = vmax.f32 %v534_v45, 0.0  ;;  %v417_v50 = vpop.f32.mrf.mxu0  ;;  %v457_v51 = vpop.f32.mrf.mxu1 }
 0x108   :  { %v556_v58 = vmax.f32 %v417_v50, 0.0  ;;  %v572_v59 = vmax.f32 %v457_v51, 0.0 }
 0x109   :  { %v1063_v52 = vpack.c.bf16 %v587_v48, %v586_v46  ;;  %v1103_v53 = vpack.c.bf16 %v603_v49, %v602_v47 }
 0x10b   :  { %1131 = vst [vmem:[%s1412_s2 + $0xb0] sm:$0xff] %v1063_v52  }
 0x10c   :  { %1139 = vst [vmem:[%s1412_s2 + $0xf0] sm:$0xff] %v1103_v53  }
 0x10e   :  { %v497_v54 = vpop.f32.mrf.mxu2  ;;  %v537_v55 = vpop.f32.mrf.mxu3 }
 0x10f   :  { %v419_v56 = vpop.f32.mrf.mxu0  ;;  %v459_v57 = vpop.f32.mrf.mxu1  ;;  %v588_v2 = vmax.f32 %v497_v54, 0.0  ;;  %v604_v3 = vmax.f32 %v537_v55, 0.0 }
 0x110   :  { %v557_v60 = vmax.f32 %v419_v56, 0.0  ;;  %v573_v61 = vmax.f32 %v459_v57, 0.0 }
 0x112   :  { %v988_v62 = vpack.c.bf16 %v557_v60, %v556_v58  ;;  %v1028_v63 = vpack.c.bf16 %v573_v61, %v572_v59 }
 0x114   :  { %1116 = vst [vmem:[%s1412_s2 + $0x38] sm:$0xff] %v988_v62  }
 0x115   :  { %1124 = vst [vmem:[%s1412_s2 + $0x78] sm:$0xff] %v1028_v63  }
 0x116   :  { %v499_v0 = vpop.f32.mrf.mxu2  ;;  %v539_v1 = vpop.f32.mrf.mxu3 }
 0x117   :  { %v589_v4 = vmax.f32 %v499_v0, 0.0  ;;  %v605_v5 = vmax.f32 %v539_v1, 0.0 }
 0x119   :  { %v1068_v6 = vpack.c.bf16 %v589_v4, %v588_v2  ;;  %v1108_v7 = vpack.c.bf16 %v605_v5, %v604_v3 }
 0x11b   :  { %1132 = vst [vmem:[%s1412_s2 + $0xb8] sm:$0xff] %v1068_v6  }
 0x11c   :  { %1140 = vst [vmem:[%s1412_s2 + $0xf8] sm:$0xff] %v1108_v7  }

// kernel: skip_adaptor_forward.7
= control target key start
LH: loop header
LB: loop body
LE: loop exit
PB: predicated region body
PF: predicated region fallthrough
CT: control target
= control target key end

     0   :  { %vm129_vm0 = vcmask 1043456   ;;  %vm104_vm1 = vcmask 588800   ;;  %s450_s1 = inlined_call_operand.vmem [shape: bf16[72,128], index: 1, kind: input, shape index: {}]   ;;  %s451_s0 = inlined_call_operand.vmem [shape: bf16[128,72], index: 0, kind: input, shape index: {}]   ;;  %s452_s2 = inlined_call_operand.vmem [shape: bf16[128,128], index: 2, kind: output, shape index: {}]  }
   0x1   :  { %v36_v0 = vld [vmem:[%s450_s1 + $0x20] sm:$0xf]  ;;  %v301_v4 = vld [vmem:[%s450_s1 + $0x18] sm:$0xff]  ;;  %v300_v5 = vld [vmem:[%s450_s1 + $0x10] sm:$0xff] }
   0x2   :  { %v94_v1 = vunpack.c.l.b16 %v36_v0  ;;  %v299_v6 = vld [vmem:[%s450_s1 + $0x8] sm:$0xff]  ;;  %v298_v7 = vld [vmem:[%s450_s1] sm:$0xff]  ;;  %v292_v9 = vld [vmem:[%s451_s0 + $0x10] sm:$0xff] }
   0x3   :  { %v290_v8 = vld [vmem:[%s451_s0] sm:$0xff]  ;;  %v296_v11 = vld [vmem:[%s451_s0 + $0x30] sm:$0xff]  ;;  %v291_v12 = vld [vmem:[%s451_s0 + $0x8] sm:$0xff] }
   0x4   :  { %v99_v2 = vpack.c.b16 %v94_v1, %v94_v1  ;;  %v294_v10 = vld [vmem:[%s451_s0 + $0x20] sm:$0xff]  ;;  %v293_v13 = vld [vmem:[%s451_s0 + $0x18] sm:$0xff]  ;;  %v295_v14 = vld [vmem:[%s451_s0 + $0x28] sm:$0xff] }
   0x5   :  { %v297_v15 = vld [vmem:[%s451_s0 + $0x38] sm:$0xff] }
   0x6   :  { %v131_v3 = vsel %vm129_vm0, %v99_v2, 0 }
   0x7   :  { %136 = vmatpush.bf16.msra.mxu0 %v131_v3  ;;  %349 = vmatpush.bf16.msra.mxu1 %v131_v3 }
   0x8   :  { %350 = vmatpush.bf16.msra.mxu2 %v131_v3  ;;  %351 = vmatpush.bf16.msra.mxu3 %v131_v3 }
   0xb   :  { %137 = vmatpush.bf16.msra.mxu0 %v301_v4  ;;  %352 = vmatpush.bf16.msra.mxu1 %v301_v4 }
   0xc   :  { %353 = vmatpush.bf16.msra.mxu2 %v301_v4  ;;  %354 = vmatpush.bf16.msra.mxu3 %v301_v4 }
   0xf   :  { %138 = vmatpush.bf16.msra.mxu0 %v300_v5  ;;  %355 = vmatpush.bf16.msra.mxu1 %v300_v5 }
  0x10   :  { %356 = vmatpush.bf16.msra.mxu2 %v300_v5  ;;  %357 = vmatpush.bf16.msra.mxu3 %v300_v5 }
  0x13   :  { %139 = vmatpush.bf16.msra.mxu0 %v299_v6  ;;  %358 = vmatpush.bf16.msra.mxu1 %v299_v6 }
  0x14   :  { %359 = vmatpush.bf16.msra.mxu2 %v299_v6  ;;  %360 = vmatpush.bf16.msra.mxu3 %v299_v6 }
  0x17   :  { %140 = vmatpush.bf16.msra.mxu0 %v298_v7  ;;  %361 = vmatpush.bf16.msra.mxu1 %v298_v7 }
  0x18   :  { %362 = vmatpush.bf16.msra.mxu2 %v298_v7  ;;  %363 = vmatpush.bf16.msra.mxu3 %v298_v7 }
  0x1a   :  { %282 = vmatmul.msk.bf16.vlgmr.msra.gmra.mxu0 %vm104_vm1, %v290_v8  ;;  %284 = vmatmul.msk.bf16.vlgmr.msra.gmra.mxu1 %vm104_vm1, %v292_v9 }
  0x1b   :  { %286 = vmatmul.msk.bf16.vlgmr.msra.gmra.mxu2 %vm104_vm1, %v294_v10  ;;  %288 = vmatmul.msk.bf16.vlgmr.msra.gmra.mxu3 %vm104_vm1, %v296_v11 }
  0x2a   :  { %283 = vmatmul.msk.bf16.gmra.mxu0 %vm104_vm1, %v291_v12  ;;  %285 = vmatmul.msk.bf16.gmra.mxu1 %vm104_vm1, %v293_v13 }
  0x2b   :  { %287 = vmatmul.msk.bf16.gmra.mxu2 %vm104_vm1, %v295_v14  ;;  %289 = vmatmul.msk.bf16.gmra.mxu3 %vm104_vm1, %v297_v15 }
  0x97   :  { %v142_v16 = vpop.f32.mrf.mxu0  ;;  %v152_v17 = vpop.f32.mrf.mxu1 }
  0x98   :  { %v182_v22 = vmax.f32 %v142_v16, 0.0  ;;  %v186_v23 = vmax.f32 %v152_v17, 0.0 }
  0x9e   :  { %v162_v18 = vpop.f32.mrf.mxu2  ;;  %v172_v19 = vpop.f32.mrf.mxu3 }
  0x9f   :  { %v144_v20 = vpop.f32.mrf.mxu0  ;;  %v154_v21 = vpop.f32.mrf.mxu1  ;;  %v190_v30 = vmax.f32 %v162_v18, 0.0  ;;  %v194_v31 = vmax.f32 %v172_v19, 0.0 }
  0xa0   :  { %v183_v24 = vmax.f32 %v144_v20, 0.0  ;;  %v187_v25 = vmax.f32 %v154_v21, 0.0 }
  0xa2   :  { %v305_v26 = vpack.c.bf16 %v183_v24, %v182_v22  ;;  %v315_v27 = vpack.c.bf16 %v187_v25, %v186_v23 }
  0xa4   :  { %306 = vst [vmem:[%s452_s2] sm:$0xff] %v305_v26  }
  0xa5   :  { %343 = vst [vmem:[%s452_s2 + $0x10] sm:$0xff] %v315_v27  }
  0xa6   :  { %v164_v28 = vpop.f32.mrf.mxu2  ;;  %v174_v29 = vpop.f32.mrf.mxu3 }
  0xa7   :  { %v191_v32 = vmax.f32 %v164_v28, 0.0  ;;  %v195_v33 = vmax.f32 %v174_v29, 0.0  ;;  %v147_v34 = vpop.f32.mrf.mxu0  ;;  %v157_v35 = vpop.f32.mrf.mxu1 }
  0xa8   :  { %v184_v42 = vmax.f32 %v147_v34, 0.0  ;;  %v188_v43 = vmax.f32 %v157_v35, 0.0 }
  0xa9   :  { %v325_v36 = vpack.c.bf16 %v191_v32, %v190_v30  ;;  %v335_v37 = vpack.c.bf16 %v195_v33, %v194_v31 }
  0xab   :  { %345 = vst [vmem:[%s452_s2 + $0x20] sm:$0xff] %v325_v36  }
  0xac   :  { %347 = vst [vmem:[%s452_s2 + $0x30] sm:$0xff] %v335_v37  }
  0xae   :  { %v167_v38 = vpop.f32.mrf.mxu2  ;;  %v177_v39 = vpop.f32.mrf.mxu3 }
  0xaf   :  { %v149_v40 = vpop.f32.mrf.mxu0  ;;  %v159_v41 = vpop.f32.mrf.mxu1  ;;  %v192_v50 = vmax.f32 %v167_v38, 0.0  ;;  %v196_v51 = vmax.f32 %v177_v39, 0.0 }
  0xb0   :  { %v185_v44 = vmax.f32 %v149_v40, 0.0  ;;  %v189_v45 = vmax.f32 %v159_v41, 0.0 }
  0xb2   :  { %v310_v46 = vpack.c.bf16 %v185_v44, %v184_v42  ;;  %v320_v47 = vpack.c.bf16 %v189_v45, %v188_v43 }
  0xb4   :  { %342 = vst [vmem:[%s452_s2 + $0x8] sm:$0xff] %v310_v46  }
  0xb5   :  { %344 = vst [vmem:[%s452_s2 + $0x18] sm:$0xff] %v320_v47  }
  0xb6   :  { %v169_v48 = vpop.f32.mrf.mxu2  ;;  %v179_v49 = vpop.f32.mrf.mxu3 }
  0xb7   :  { %v193_v52 = vmax.f32 %v169_v48, 0.0  ;;  %v197_v53 = vmax.f32 %v179_v49, 0.0 }
  0xb9   :  { %v330_v54 = vpack.c.bf16 %v193_v52, %v192_v50  ;;  %v340_v55 = vpack.c.bf16 %v197_v53, %v196_v51 }
  0xbb   :  { %346 = vst [vmem:[%s452_s2 + $0x28] sm:$0xff] %v330_v54  }
  0xbc   :  { %348 = vst [vmem:[%s452_s2 + $0x38] sm:$0xff] %v340_v55  }

// kernel: skip_adaptor_forward.8
= control target key start
LH: loop header
LB: loop body
LE: loop exit
PB: predicated region body
PF: predicated region fallthrough
CT: control target
= control target key end

     0   :  { %vm106_vm0 = vcmask 130048   ;;  %s327_s1 = inlined_call_operand.vmem [shape: bf16[144,128], index: 1, kind: input, shape index: {}]   ;;  %s328_s0 = inlined_call_operand.vmem [shape: bf16[32,144], index: 0, kind: input, shape index: {}]   ;;  %s329_s2 = inlined_call_operand.vmem [shape: bf16[32,128], index: 2, kind: output, shape index: {}]  }
   0x1   :  { %v232_v0 = vld [vmem:[%s327_s1 + $0x38] sm:$0xff]  ;;  %v233_v1 = vld [vmem:[%s327_s1 + $0x40] sm:$0xff]  ;;  %v231_v3 = vld [vmem:[%s327_s1 + $0x30] sm:$0xff] }
   0x2   :  { %v221_v2 = vld [vmem:[%s328_s0 + $0x4] sm:$0xf]  ;;  %113 = vmatpush.bf16.msra.mxu0 %v232_v0  ;;  %245 = vmatpush.bf16.msra.mxu2 %v232_v0  ;;  %v171_v4 = vld [vmem:[%s328_s0 + $0x8] sm:$0xf0]  ;;  %v228_v8 = vld [vmem:[%s327_s1 + $0x18] sm:$0xff] }
   0x3   :  { %139 = vmatpush.bf16.msra.mxu1 %v233_v1  ;;  %v174_v5 = vor.u32 %v221_v2, %v171_v4  ;;  %v230_v6 = vld [vmem:[%s327_s1 + $0x28] sm:$0xff]  ;;  %v229_v7 = vld [vmem:[%s327_s1 + $0x20] sm:$0xff]  ;;  %v223_v9 = vld [vmem:[%s328_s0 + $0x14] sm:$0xf] }
   0x4   :  { %v179_v10 = vld [vmem:[%s328_s0 + $0x18] sm:$0xf0]  ;;  %v227_v11 = vld [vmem:[%s327_s1 + $0x10] sm:$0xff]  ;;  %v226_v13 = vld [vmem:[%s327_s1 + $0x8] sm:$0xff] }
   0x5   :  { %v182_v12 = vor.u32 %v223_v9, %v179_v10  ;;  %v225_v14 = vld [vmem:[%s327_s1] sm:$0xff]  ;;  %v222_v16 = vld [vmem:[%s328_s0 + $0x4] sm:$0xf0]  ;;  %v177_v17 = vld [vmem:[%s328_s0 + $0x10] sm:$0xf] }
   0x6   :  { %114 = vmatpush.bf16.msra.mxu0 %v231_v3  ;;  %246 = vmatpush.bf16.msra.mxu2 %v231_v3  ;;  %v169_v15 = vld [vmem:[%s328_s0] sm:$0xf]  ;;  %v224_v18 = vld [vmem:[%s328_s0 + $0x14] sm:$0xf0] }
   0x7   :  { %219 = vmatmul.msk.bf16.vlgmr.msra.gmra.mxu1 %vm106_vm0, %v174_v5  ;;  %v170_v19 = vor.u32 %v222_v16, %v169_v15  ;;  %v178_v20 = vor.u32 %v224_v18, %v177_v17 }
   0xa   :  { %115 = vmatpush.bf16.msra.mxu0 %v230_v6  ;;  %247 = vmatpush.bf16.msra.mxu2 %v230_v6 }
   0xe   :  { %116 = vmatpush.bf16.msra.mxu0 %v229_v7  ;;  %248 = vmatpush.bf16.msra.mxu2 %v229_v7 }
  0x12   :  { %117 = vmatpush.bf16.msra.mxu0 %v228_v8  ;;  %249 = vmatpush.bf16.msra.mxu2 %v228_v8 }
  0x16   :  { %118 = vmatpush.bf16.msra.mxu0 %v227_v11  ;;  %250 = vmatpush.bf16.msra.mxu2 %v227_v11 }
  0x17   :  { %220 = vmatmul.msk.bf16.gmra.mxu1 %vm106_vm0, %v182_v12 }
  0x1a   :  { %119 = vmatpush.bf16.msra.mxu0 %v226_v13  ;;  %251 = vmatpush.bf16.msra.mxu2 %v226_v13 }
  0x1e   :  { %120 = vmatpush.bf16.msra.mxu0 %v225_v14  ;;  %252 = vmatpush.bf16.msra.mxu2 %v225_v14 }
  0x21   :  { %121 = vmatmul.bf16.vlgmr.msra.gmra.mxu0 %v170_v19  ;;  %126 = vmatmul.bf16.vlgmr.msra.gmra.mxu2 %v178_v20 }
  0x84   :  { %v141_v21 = vpop.f32.mrf.mxu1 }
  0x8c   :  { %v143_v22 = vpop.f32.mrf.mxu1 }
  0x94   :  { %v146_v24 = vpop.f32.mrf.mxu1 }
  0x9c   :  { %v148_v33 = vpop.f32.mrf.mxu1 }
  0x9e   :  { %v122_v23 = vpop.f32.mrf.mxu0 }
  0x9f   :  { %v142_v26 = vadd.f32 %v141_v21, %v122_v23 }
  0xa1   :  { %v151_v29 = vmax.f32 %v142_v26, 0.0 }
  0xa4   :  { %v127_v25 = vpop.f32.mrf.mxu2 }
  0xa5   :  { %v147_v31 = vadd.f32 %v146_v24, %v127_v25 }
  0xa6   :  { %v124_v27 = vpop.f32.mrf.mxu0 }
  0xa7   :  { %v144_v28 = vadd.f32 %v143_v22, %v124_v27  ;;  %v153_v36 = vmax.f32 %v147_v31, 0.0 }
  0xa9   :  { %v152_v30 = vmax.f32 %v144_v28, 0.0 }
  0xab   :  { %v237_v32 = vpack.c.bf16 %v152_v30, %v151_v29 }
  0xac   :  { %v129_v34 = vpop.f32.mrf.mxu2 }
  0xad   :  { %238 = vst [vmem:[%s329_s2] sm:$0xff] %v237_v32   ;;  %v149_v35 = vadd.f32 %v148_v33, %v129_v34 }
  0xaf   :  { %v154_v37 = vmax.f32 %v149_v35, 0.0 }
  0xb1   :  { %v242_v38 = vpack.c.bf16 %v154_v37, %v153_v36 }
  0xb3   :  { %244 = vst [vmem:[%s329_s2 + $0x8] sm:$0xff] %v242_v38  }

// kernel: skip_adaptor_forward.9
= control target key start
LH: loop header
LB: loop body
LE: loop exit
PB: predicated region body
PF: predicated region fallthrough
CT: control target
= control target key end

     0   :  { %vm205_vm0 = vcmask 261120   ;;  %s694_s1 = inlined_call_operand.vmem [shape: bf16[288,128], index: 1, kind: input, shape index: {}]   ;;  %s695_s0 = inlined_call_operand.vmem [shape: bf16[32,288], index: 0, kind: input, shape index: {}]   ;;  %s696_s3 = inlined_call_operand.vmem [shape: bf16[128,128], index: 3, kind: input, shape index: {}]   ;;  %s697_s2 = inlined_call_operand.vmem [shape: bf16[8,32], index: 2, kind: input, shape index: {}]   ;;  %s698_s4 = inlined_call_operand.vmem [shape: f32[8,128], index: 4, kind: output, shape index: {}]  }
   0x1   :  { %v527_v0 = vld [vmem:[%s694_s1 + $0x38] sm:$0xff]  ;;  %v526_v2 = vld [vmem:[%s694_s1 + $0x30] sm:$0xff]  ;;  %v537_v4 = vld [vmem:[%s694_s1 + $0x88] sm:$0xff] }
   0x2   :  { %v535_v1 = vld [vmem:[%s694_s1 + $0x78] sm:$0xff]  ;;  %212 = vmatpush.bf16.msra.mxu0 %v527_v0  ;;  %v534_v3 = vld [vmem:[%s694_s1 + $0x70] sm:$0xff]  ;;  %256 = vmatpush.bf16.msra.mxu2 %v537_v4  ;;  %v536_v5 = vld [vmem:[%s694_s1 + $0x80] sm:$0xff] }
   0x3   :  { %231 = vmatpush.bf16.msra.mxu1 %v535_v1  ;;  %v393_v6 = vld [vmem:[%s695_s0 + $0x8] sm:$0xf]  ;;  %v516_v7 = vld [vmem:[%s695_s0 + $0x10] sm:$0xf0]  ;;  %v524_v11 = vld [vmem:[%s694_s1 + $0x20] sm:$0xff] }
   0x4   :  { %v525_v8 = vld [vmem:[%s694_s1 + $0x28] sm:$0xff]  ;;  %v394_v10 = vor.u32 %v516_v7, %v393_v6  ;;  %v532_v12 = vld [vmem:[%s694_s1 + $0x60] sm:$0xff]  ;;  %v523_v13 = vld [vmem:[%s694_s1 + $0x18] sm:$0xff] }
   0x5   :  { %v533_v9 = vld [vmem:[%s694_s1 + $0x68] sm:$0xff]  ;;  %v531_v14 = vld [vmem:[%s694_s1 + $0x58] sm:$0xff]  ;;  %v522_v15 = vld [vmem:[%s694_s1 + $0x10] sm:$0xff] }
   0x6   :  { %213 = vmatpush.bf16.msra.mxu0 %v526_v2  ;;  %257 = vmatpush.bf16.msra.mxu2 %v536_v5  ;;  %v530_v16 = vld [vmem:[%s694_s1 + $0x50] sm:$0xff]  ;;  %v405_v17 = vld [vmem:[%s695_s0 + $0x20] sm:$0xf]  ;;  %v519_v18 = vld [vmem:[%s695_s0 + $0x28] sm:$0xf0] }
   0x7   :  { %232 = vmatpush.bf16.msra.mxu1 %v534_v3  ;;  %v521_v19 = vld [vmem:[%s694_s1 + $0x8] sm:$0xff]  ;;  %v406_v21 = vor.u32 %v519_v18, %v405_v17  ;;  %v520_v22 = vld [vmem:[%s694_s1] sm:$0xff]  ;;  %v387_v27 = vld [vmem:[%s695_s0 + $0xc] sm:$0xf0] }
   0x8   :  { %v529_v20 = vld [vmem:[%s694_s1 + $0x48] sm:$0xff]  ;;  %v528_v23 = vld [vmem:[%s694_s1 + $0x40] sm:$0xff]  ;;  %v397_v30 = vld [vmem:[%s695_s0 + $0x18] sm:$0xf] }
   0x9   :  { %479 = vmatmul.msk.bf16.vlgmr.msra.gmra.mxu2 %vm205_vm0, %v394_v10  ;;  %v385_v24 = vld [vmem:[%s695_s0] sm:$0xf]  ;;  %v515_v25 = vld [vmem:[%s695_s0 + $0x8] sm:$0xf0]  ;;  %v514_v26 = vld [vmem:[%s695_s0 + $0x4] sm:$0xf] }
   0xa   :  { %214 = vmatpush.bf16.msra.mxu0 %v525_v8  ;;  %v386_v28 = vor.u32 %v515_v25, %v385_v24  ;;  %v390_v29 = vor.u32 %v514_v26, %v387_v27  ;;  %v518_v31 = vld [vmem:[%s695_s0 + $0x20] sm:$0xf0]  ;;  %v517_v32 = vld [vmem:[%s695_s0 + $0x1c] sm:$0xf]  ;;  %v399_v33 = vld [vmem:[%s695_s0 + $0x24] sm:$0xf0] }
   0xb   :  { %233 = vmatpush.bf16.msra.mxu1 %v533_v9  ;;  %v398_v34 = vor.u32 %v518_v31, %v397_v30  ;;  %v402_v35 = vor.u32 %v517_v32, %v399_v33  ;;  %v545_v42 = vld [vmem:[%s696_s3 + $0x38] sm:$0xff]  ;;  %v544_v43 = vld [vmem:[%s696_s3 + $0x30] sm:$0xff]  ;;  %v543_v44 = vld [vmem:[%s696_s3 + $0x28] sm:$0xff] }
   0xc   :  { %365 = vmatpush.bf16.msrb.mxu2 %v545_v42  ;;  %v542_v48 = vld [vmem:[%s696_s3 + $0x20] sm:$0xff]  ;;  %v541_v50 = vld [vmem:[%s696_s3 + $0x18] sm:$0xff]  ;;  %v540_v58 = vld [vmem:[%s696_s3 + $0x10] sm:$0xff] }
   0xd   :  { %v539_v0 = vld [vmem:[%s696_s3 + $0x8] sm:$0xff]  ;;  %v276_v5 = vld [vmem:[%s697_s2] sm:$0xf] }
   0xe   :  { %215 = vmatpush.bf16.msra.mxu0 %v524_v11  ;;  %v538_v6 = vld [vmem:[%s696_s3] sm:$0xff] }
   0xf   :  { %234 = vmatpush.bf16.msra.mxu1 %v532_v12 }
  0x10   :  { %366 = vmatpush.bf16.msrb.mxu2 %v544_v43 }
  0x12   :  { %216 = vmatpush.bf16.msra.mxu0 %v523_v13 }
  0x13   :  { %235 = vmatpush.bf16.msra.mxu1 %v531_v14 }
  0x14   :  { %367 = vmatpush.bf16.msrb.mxu2 %v543_v44 }
  0x16   :  { %217 = vmatpush.bf16.msra.mxu0 %v522_v15 }
  0x17   :  { %236 = vmatpush.bf16.msra.mxu1 %v530_v16 }
  0x18   :  { %368 = vmatpush.bf16.msrb.mxu2 %v542_v48 }
  0x19   :  { %480 = vmatmul.msk.bf16.gmra.mxu2 %vm205_vm0, %v406_v21 }
  0x1a   :  { %218 = vmatpush.bf16.msra.mxu0 %v521_v19 }
  0x1b   :  { %237 = vmatpush.bf16.msra.mxu1 %v529_v20 }
  0x1c   :  { %369 = vmatpush.bf16.msrb.mxu2 %v541_v50 }
  0x1e   :  { %219 = vmatpush.bf16.msra.mxu0 %v520_v22 }
  0x1f   :  { %238 = vmatpush.bf16.msra.mxu1 %v528_v23 }
  0x20   :  { %370 = vmatpush.bf16.msrb.mxu2 %v540_v58 }
  0x21   :  { %220 = vmatmul.bf16.vlgmr.msra.gmra.mxu0 %v386_v28 }
  0x22   :  { %239 = vmatmul.bf16.vlgmr.msra.gmra.mxu1 %v390_v29 }
  0x24   :  { %371 = vmatpush.bf16.msrb.mxu2 %v539_v0 }
  0x28   :  { %372 = vmatpush.bf16.msrb.mxu2 %v538_v6 }
  0x31   :  { %225 = vmatmul.bf16.gmra.mxu0 %v398_v34 }
  0x32   :  { %244 = vmatmul.bf16.gmra.mxu1 %v402_v35 }
  0x8c   :  { %v259_v36 = vpop.f32.mrf.mxu2 }
  0x94   :  { %v261_v39 = vpop.f32.mrf.mxu2 }
  0x9c   :  { %v264_v45 = vpop.f32.mrf.mxu2 }
  0x9e   :  { %v221_v37 = vpop.f32.mrf.mxu0 }
  0x9f   :  { %v240_v38 = vpop.f32.mrf.mxu1 }
  0xa0   :  { %v241_v54 = vadd.f32 %v240_v38, %v221_v37 }
  0xa2   :  { %v260_v61 = vadd.f32 %v259_v36, %v241_v54 }
  0xa4   :  { %v266_v57 = vpop.f32.mrf.mxu2  ;;  %v269_v3 = vmax.f32 %v260_v61, 0.0 }
  0xa6   :  { %v223_v40 = vpop.f32.mrf.mxu0 }
  0xa7   :  { %v242_v41 = vpop.f32.mrf.mxu1 }
  0xa8   :  { %v243_v51 = vadd.f32 %v242_v41, %v223_v40 }
  0xaa   :  { %v262_v59 = vadd.f32 %v261_v39, %v243_v51 }
  0xac   :  { %v270_v1 = vmax.f32 %v262_v59, 0.0 }
  0xae   :  { %v226_v46 = vpop.f32.mrf.mxu0  ;;  %v273_v4 = vpack.c.bf16 %v270_v1, %v269_v3 }
  0xaf   :  { %v245_v47 = vpop.f32.mrf.mxu1 }
  0xb0   :  { %v246_v49 = vadd.f32 %v245_v47, %v226_v46 }
  0xb2   :  { %v265_v56 = vadd.f32 %v264_v45, %v246_v49 }
  0xb4   :  { %v271_v62 = vmax.f32 %v265_v56, 0.0 }
  0xb6   :  { %v228_v52 = vpop.f32.mrf.mxu0 }
  0xb7   :  { %v247_v53 = vpop.f32.mrf.mxu1 }
  0xb8   :  { %v248_v55 = vadd.f32 %v247_v53, %v228_v52 }
  0xba   :  { %v267_v60 = vadd.f32 %v266_v57, %v248_v55 }
  0xbc   :  { %v272_v63 = vmax.f32 %v267_v60, 0.0 }
  0xbe   :  { %v274_v2 = vpack.c.bf16 %v272_v63, %v271_v62 }
  0xc0   :  { %286 = vmatpush.bf16.msra.mxu3 %v274_v2 }
  0xc4   :  { %287 = vmatpush.bf16.msra.mxu3 %v273_v4 }
  0xc7   :  { %481 = vmatmul.msk.bf16.vlgmr.msra.gmra.mxu3 %vm205_vm0, %v276_v5 }
 0x14a   :  { %v289_v7 = vpop.f32.mrf.mxu3 }
 0x14b   :  { %v299_v8 = vmul.f32 0.0625, %v289_v7 }
 0x14d   :  { %v300_v9 = vpack.c.bf16 %v299_v8, %v299_v8 }
 0x14f   :  { %373 = vmatmul.bf16.vlgmr.msrb.gmra.mxu2 %v300_v9 }
 0x152   :  { %v291_v10 = vpop.f32.mrf.mxu3 }
 0x1d2   :  { %v374_v11 = vpop.f32.mrf.mxu2 }
 0x1d3   :  { %378 = vst [vmem:[%s698_s4] sm:$0xff] %v374_v11 }
 0x1da   :  { %v376_v12 = vpop.f32.mrf.mxu2 }

</bundles_post_ra>
